<compile_context>
chip_gen: v6e
topology: v6e:2x2x1
jax: 0.10.0
libtpu: 0.0.40
codegen_flags: <defaults>
</compile_context>

<pallas_src>
import functools

import jax
import jax.numpy as jnp
from jax.experimental import pallas as pl
from jax.experimental.pallas import tpu as pltpu

N_EMBD = 384          # matches module-level constant in the reference script
HIDDEN = 4 * N_EMBD   # 1536


def _round_up(v, m):
    return ((v + m - 1) // m) * m


@functools.lru_cache(maxsize=1)
def _tile_config():
    """(row-tile cap, min grid steps, vmem_limit_bytes) chosen per TPU generation."""
    cap, min_steps, vmem = 512, 1, None            # conservative default (v5e-safe)
    try:
        kind = jax.devices()[0].device_kind.lower()
    except Exception:
        return cap, min_steps, vmem
    if "v7" in kind or "tpu7" in kind:
        # 2 TensorCores/chip: want >= 2 grid steps; 64 MiB physical VMEM -> headroom.
        cap, min_steps, vmem = 1024, 2, 48 << 20
    elif "v6" in kind:
        cap, min_steps, vmem = 1024, 1, 64 << 20
    return cap, min_steps, vmem


def _choose_tm(m):
    """Row tile: multiple of 8, <= cap, near-balanced steps, >= min_steps steps."""
    cap, min_steps, _ = _tile_config()
    n_steps = max(min_steps, pl.cdiv(m, cap))
    tm = _round_up(pl.cdiv(m, n_steps), 8)
    if m >= 8:
        tm = min(tm, (m // 8) * 8)   # keep block <= rows; boundary block covers m % 8
    return max(tm, 8)


def ffn_kernel(x_ref, w1_ref, b1_ref, w2_ref, b2_ref, o_ref):
    # x_ref:  (tm, C)  f32 row tile of the flattened (B*T, C) input
    # w1_ref: (C, 4C)  bf16, b1_ref: (1, 4C) f32
    # w2_ref: (4C, C)  bf16, b2_ref: (1, C)  f32
    x = x_ref[...].astype(jnp.bfloat16)                  # cast only at the MXU boundary
    h = jnp.dot(x, w1_ref[...], preferred_element_type=jnp.float32)
    h = jnp.maximum(h + b1_ref[...], 0.0)                # bias + ReLU stay f32 (VPU)
    o = jnp.dot(h.astype(jnp.bfloat16), w2_ref[...],
                preferred_element_type=jnp.float32) + b2_ref[...]
    o_ref[...] = o.astype(o_ref.dtype)                   # Dropout(eval) == identity


def _build_ffn_call(m, c, hid, tm, out_dtype):
    _, _, vmem_limit = _tile_config()
    cost = pl.CostEstimate(
        flops=4 * m * c * hid,                                    # two matmuls
        transcendentals=0,
        bytes_accessed=2 * m * c * 4 + 2 * c * hid * 2 + (hid + c) * 4,
    )
    grid_spec = pltpu.PrefetchScalarGridSpec(
        num_scalar_prefetch=0,
        grid=(pl.cdiv(m, tm),),
        in_specs=[
            pl.BlockSpec((tm, c), lambda i: (i, 0)),      # x row tile
            pl.BlockSpec((c, hid), lambda i: (0, 0)),     # w1 (resident, constant map)
            pl.BlockSpec((1, hid), lambda i: (0, 0)),     # b1
            pl.BlockSpec((hid, c), lambda i: (0, 0)),     # w2 (resident, constant map)
            pl.BlockSpec((1, c), lambda i: (0, 0)),       # b2
        ],
        out_specs=pl.BlockSpec((tm, c), lambda i: (i, 0)),
    )
    return pl.pallas_call(
        ffn_kernel,
        out_shape=jax.ShapeDtypeStruct((m, c), out_dtype),
        grid_spec=grid_spec,
        cost_estimate=cost,
        compiler_params=pltpu.CompilerParams(
            dimension_semantics=("parallel",),
            vmem_limit_bytes=vmem_limit,
        ),
    )


def prepare_params(w1, b1, w2, b2):
    """One-time preprocessing (do NOT do this per call): bf16 weights, 2-D f32 biases."""
    return (w1.astype(jnp.bfloat16),
            b1.reshape(1, -1).astype(jnp.float32),
            w2.astype(jnp.bfloat16),
            b2.reshape(1, -1).astype(jnp.float32))


@jax.jit
def feed_forward(x, w1_bf, b1_2d, w2_bf, b2_2d):
    """x: (B, T, C) float32; params from prepare_params(). Returns (B, T, C) f32."""
    B, T, C = x.shape
    H = w1_bf.shape[1]
    M = B * T
    tm = _choose_tm(M)

    x2 = x.reshape(M, C)
    m_in = M
    if M < tm:                      # tiny-M corner only (M < 8): pad a few rows
        m_in = tm
        x2 = jnp.pad(x2, ((0, tm - M), (0, 0)))

    out = _build_ffn_call(m_in, C, H, tm, x.dtype)(x2, w1_bf, b1_2d, w2_bf, b2_2d)
    if m_in != M:
        out = out[:M]
    return out.reshape(B, T, C)


def init_params(key, n_embd):
    """Deterministic init mimicking nn.Linear default (uniform +-1/sqrt(fan_in))."""
    hidden = 4 * n_embd
    k1, k2, k3, k4 = jax.random.split(key, 4)
    bound1 = 1.0 / jnp.sqrt(n_embd)
    bound2 = 1.0 / jnp.sqrt(hidden)
    # stored as (in_features, out_features), i.e. transpose of torch's weight layout
    w1 = jax.random.uniform(k1, (n_embd, hidden), jnp.float32, -bound1, bound1)
    b1 = jax.random.uniform(k2, (hidden,), jnp.float32, -bound1, bound1)
    w2 = jax.random.uniform(k3, (hidden, n_embd), jnp.float32, -bound2, bound2)
    b2 = jax.random.uniform(k4, (n_embd,), jnp.float32, -bound2, bound2)
    return w1, b1, w2, b2


def _reference_bf16(x, w1, b1, w2, b2):
    """Mirror of the kernel's numerics (bf16 MXU operands, f32 accumulate/elementwise)."""
    B, T, C = x.shape
    xb = x.reshape(-1, C).astype(jnp.bfloat16)
    w1b = w1.astype(jnp.bfloat16)
    w2b = w2.astype(jnp.bfloat16)
    h = jnp.maximum(jnp.dot(xb, w1b, preferred_element_type=jnp.float32) + b1, 0.0)
    o = jnp.dot(h.astype(jnp.bfloat16), w2b, preferred_element_type=jnp.float32) + b2
    return o.reshape(B, T, C).astype(x.dtype)


if __name__ == "__main__":
    key = jax.random.PRNGKey(0)
    kx, kp, kx2 = jax.random.split(key, 3)

    w1, b1, w2, b2 = init_params(kp, N_EMBD)
    params = prepare_params(w1, b1, w2, b2)      # hoisted one-time bf16 cast

    # Case 1: small (B, T, C) consistent with the module (n_embd fixed at 384).
    B, T = 2, 8
    x = jax.random.normal(kx, (B, T, N_EMBD), jnp.float32)
    out = jax.block_until_ready(feed_forward(x, *params))

    ref_bf16 = _reference_bf16(x, w1, b1, w2, b2)
    ref_f32 = (jnp.maximum(x.reshape(-1, N_EMBD) @ w1 + b1, 0.0) @ w2 + b2
               ).reshape(B, T, N_EMBD)
    assert out.shape == (B, T, N_EMBD)
    assert jnp.allclose(out, ref_bf16, atol=2e-3, rtol=2e-3)
    assert jnp.allclose(out, ref_f32, atol=5e-2, rtol=5e-2)

    # Case 2: B*T not a multiple of 8 -> exercises the masked partial boundary block.
    B2, T2 = 3, 5
    x_odd = jax.random.normal(kx2, (B2, T2, N_EMBD), jnp.float32)
    out_odd = jax.block_until_ready(feed_forward(x_odd, *params))
    assert out_odd.shape == (B2, T2, N_EMBD)
    assert jnp.allclose(out_odd, _reference_bf16(x_odd, w1, b1, w2, b2),
                        atol=2e-3, rtol=2e-3)

    print("KERNEL_OK")
</pallas_src>

<mosaic_0001>
module attributes {stable_mosaic.version = 11 : i64} {
  func.func @ffn_kernel(%arg0: i32, %arg1: memref<16x384xf32, #tpu.memory_space<vmem>>, %arg2: memref<384x1536xbf16, #tpu.memory_space<vmem>>, %arg3: memref<1x1536xf32, #tpu.memory_space<vmem>>, %arg4: memref<1536x384xbf16, #tpu.memory_space<vmem>>, %arg5: memref<1x384xf32, #tpu.memory_space<vmem>>, %arg6: memref<16x384xf32, #tpu.memory_space<vmem>>) attributes {dimension_semantics = [#tpu.dimension_semantics<parallel>], iteration_bounds = array<i64: 1>, scalar_prefetch = 0 : i64, scratch_operands = 0 : i64, tpu.core_type = #tpu.core_type<tc>, window_params = [{transform_indices = @transform_0, window_bounds = array<i64: 16, 384>}, {pipeline_mode = #tpu.pipeline_mode<synchronous>, transform_indices = @transform_1, window_bounds = array<i64: 384, 1536>}, {pipeline_mode = #tpu.pipeline_mode<synchronous>, transform_indices = @transform_2, window_bounds = array<i64: 1, 1536>}, {pipeline_mode = #tpu.pipeline_mode<synchronous>, transform_indices = @transform_3, window_bounds = array<i64: 1536, 384>}, {pipeline_mode = #tpu.pipeline_mode<synchronous>, transform_indices = @transform_4, window_bounds = array<i64: 1, 384>}, {transform_indices = @transform_5, window_bounds = array<i64: 16, 384>}]} {
    %c0 = arith.constant 0 : index
    %c0_0 = arith.constant 0 : index
    %0 = vector.load %arg1[%c0, %c0_0] : memref<16x384xf32, #tpu.memory_space<vmem>>, vector<16x384xf32>
    %1 = arith.truncf %0 : vector<16x384xf32> to vector<16x384xbf16>
    %c0_1 = arith.constant 0 : index
    %c0_2 = arith.constant 0 : index
    %2 = vector.load %arg2[%c0_1, %c0_2] : memref<384x1536xbf16, #tpu.memory_space<vmem>>, vector<384x1536xbf16>
    %cst = arith.constant dense<0.000000e+00> : vector<16x1536xf32>
    %3 = tpu.matmul %1, %2, %cst {dimension_numbers = #tpu.dot_dimension_numbers<[1], [0], [0], [1], [0, 0, 1, 1], [], []>} : vector<16x384xbf16>, vector<384x1536xbf16>, vector<16x1536xf32> -> vector<16x1536xf32>
    %c0_3 = arith.constant 0 : index
    %c0_4 = arith.constant 0 : index
    %4 = vector.load %arg3[%c0_3, %c0_4] : memref<1x1536xf32, #tpu.memory_space<vmem>>, vector<1x1536xf32>
    %5 = vector.broadcast %4 : vector<1x1536xf32> to vector<16x1536xf32>
    %6 = arith.addf %3, %5 : vector<16x1536xf32>
    %cst_5 = arith.constant 0.000000e+00 : f32
    %7 = vector.broadcast %cst_5 : f32 to vector<16x1536xf32>
    %8 = arith.maximumf %6, %7 : vector<16x1536xf32>
    %9 = arith.truncf %8 : vector<16x1536xf32> to vector<16x1536xbf16>
    %c0_6 = arith.constant 0 : index
    %c0_7 = arith.constant 0 : index
    %10 = vector.load %arg4[%c0_6, %c0_7] : memref<1536x384xbf16, #tpu.memory_space<vmem>>, vector<1536x384xbf16>
    %cst_8 = arith.constant dense<0.000000e+00> : vector<16x384xf32>
    %11 = tpu.matmul %9, %10, %cst_8 {dimension_numbers = #tpu.dot_dimension_numbers<[1], [0], [0], [1], [0, 0, 1, 1], [], []>} : vector<16x1536xbf16>, vector<1536x384xbf16>, vector<16x384xf32> -> vector<16x384xf32>
    %c0_9 = arith.constant 0 : index
    %c0_10 = arith.constant 0 : index
    %12 = vector.load %arg5[%c0_9, %c0_10] : memref<1x384xf32, #tpu.memory_space<vmem>>, vector<1x384xf32>
    %13 = vector.broadcast %12 : vector<1x384xf32> to vector<16x384xf32>
    %14 = arith.addf %11, %13 : vector<16x384xf32>
    %c0_11 = arith.constant 0 : index
    %c0_12 = arith.constant 0 : index
    %15 = vector.load %arg6[%c0_11, %c0_12] : memref<16x384xf32, #tpu.memory_space<vmem>>, vector<16x384xf32>
    tpu.vector_store %arg6[%c0_11, %c0_12], %14 {strides = array<i32>} : memref<16x384xf32, #tpu.memory_space<vmem>>, vector<16x384xf32>,
    return
  }
  func.func @transform_0(%arg0: i32) -> (i32, i32) {
    %c0_i32 = arith.constant 0 : i32
    %c0_i32_0 = arith.constant 0 : i32
    return %arg0, %c0_i32 : i32, i32
  }
  func.func @transform_1(%arg0: i32) -> (i32, i32) {
    %c0_i32 = arith.constant 0 : i32
    %c0_i32_0 = arith.constant 0 : i32
    %c0_i32_1 = arith.constant 0 : i32
    return %c0_i32, %c0_i32_0 : i32, i32
  }
  func.func @transform_2(%arg0: i32) -> (i32, i32) {
    %c0_i32 = arith.constant 0 : i32
    %c0_i32_0 = arith.constant 0 : i32
    %c0_i32_1 = arith.constant 0 : i32
    return %c0_i32, %c0_i32_0 : i32, i32
  }
  func.func @transform_3(%arg0: i32) -> (i32, i32) {
    %c0_i32 = arith.constant 0 : i32
    %c0_i32_0 = arith.constant 0 : i32
    %c0_i32_1 = arith.constant 0 : i32
    return %c0_i32, %c0_i32_0 : i32, i32
  }
  func.func @transform_4(%arg0: i32) -> (i32, i32) {
    %c0_i32 = arith.constant 0 : i32
    %c0_i32_0 = arith.constant 0 : i32
    %c0_i32_1 = arith.constant 0 : i32
    return %c0_i32, %c0_i32_0 : i32, i32
  }
  func.func @transform_5(%arg0: i32) -> (i32, i32) {
    %c0_i32 = arith.constant 0 : i32
    %c0_i32_0 = arith.constant 0 : i32
    return %arg0, %c0_i32 : i32, i32
  }
}

</mosaic_0001>

<bundles_post_ra>
// kernel: feed_forward.1
= control target key start
LH: loop header
LB: loop body
LE: loop exit
PB: predicated region body
PF: predicated region fallthrough
CT: control target
= control target key end

     0   :  { %10 = vsyncpa [#allocation3], 0  ;;  %s6796_s0 = inlined_call_operand.hbm [shape: f32[16,384], index: 0, kind: input, shape index: {}]   ;;  %s6797_s1 = inlined_call_operand.hbm [shape: bf16[384,1536], index: 1, kind: input, shape index: {}]   ;;  %s6798_s2 = inlined_call_operand.hbm [shape: f32[1,1536], index: 2, kind: input, shape index: {}]   ;;  %s6799_s3 = inlined_call_operand.hbm [shape: bf16[1536,384], index: 3, kind: input, shape index: {}]   ;;  %s6800_s4 = inlined_call_operand.hbm [shape: f32[1,384], index: 4, kind: input, shape index: {}]   ;;  %s6801_s5 = inlined_call_operand.hbm [shape: f32[16,384], index: 5, kind: output, shape index: {}]  }
   0x1   :  { %11 = vsyncpa [#allocation6], 0 }
   0x2   :  { %12 = vsyncpa [#allocation9], 0 }
   0x3   :  { %13 = vsyncpa [#allocation4], 0  ;;  %s6571_s18 = smov [#allocation5]  }
   0x4   :  { %s31_s19 = sshll.u32 %s6571_s18, 4  ;;  %s32_s19 = int_to_ptr.vmem [resolvable:$true] %s31_s19 }
   0x5   :  { %s6451_s20 = scalar_lea.vmem %s32_s19, 36864  ;;  %p6456_p1 = scmp.lt.s32.totalorder %s32_s19, %s32_s19 }
   0x6   :  { %p6452_p0 = scmp.ne.s32.totalorder %s32_s19, %s6451_s20  ;;  %p6457_p2 = scmp.lt.s32.totalorder %s6451_s20, %s6451_s20 }
   0x8   :  { %p6458_p3 = por %p6457_p2, %p6456_p1 }
   0xa   :  { %p6459_p4 = pnand %p6458_p3, %p6452_p0 }
   0xc   :  { %6462 = shalt.err (!%p6459_p4)
}
   0xd   :  { %s6572_s21 = smov 768   ;;  %s6573_s22 = smov 48  }
   0xe   :  { %37 = dma.hbm_to_vmem [thread:$0]  %s6797_s1, 36864, %s32_s19, [#allocation6], %s6572_s21, %s6572_s21, %s6573_s22  }
   0xf   :  { %s6574_s25 = smov [#allocation8]  }
  0x10   :  { %s53_s26 = sshll.u32 %s6574_s25, 4  ;;  %s54_s26 = int_to_ptr.vmem [resolvable:$true] %s53_s26 }
  0x11   :  { %s6471_s27 = scalar_lea.vmem %s54_s26, 36864  ;;  %p6476_p6 = scmp.lt.s32.totalorder %s54_s26, %s54_s26 }
  0x12   :  { %p6472_p5 = scmp.ne.s32.totalorder %s54_s26, %s6471_s27  ;;  %p6477_p7 = scmp.lt.s32.totalorder %s6471_s27, %s6471_s27 }
  0x14   :  { %p6478_p8 = por %p6477_p7, %p6476_p6 }
  0x16   :  { %p6479_p9 = pnand %p6478_p8, %p6472_p5 }
  0x18   :  { %6482 = shalt.err (!%p6479_p9)
}
  0x19   :  { %s6575_s28 = smov 192   ;;  %s6576_s29 = smov 12  }
  0x1a   :  { %59 = dma.hbm_to_vmem [thread:$0]  %s6799_s3, 36864, %s54_s26, [#allocation9], %s6575_s28, %s6575_s28, %s6576_s29  }
  0x1b   :  { %s6577_s7 = smov [#allocation2]  }
  0x1c   :  { %s19_s8 = sshll.u32 %s6577_s7, 4  ;;  %s20_s8 = int_to_ptr.vmem [resolvable:$true] %s19_s8 }
  0x1d   :  { %s6491_s1 = scalar_lea.vmem %s20_s8, 768  ;;  %p6496_p11 = scmp.lt.s32.totalorder %s20_s8, %s20_s8 }
  0x1e   :  { %p6492_p10 = scmp.ne.s32.totalorder %s20_s8, %s6491_s1  ;;  %p6497_p12 = scmp.lt.s32.totalorder %s6491_s1, %s6491_s1 }
  0x20   :  { %p6498_p13 = por %p6497_p12, %p6496_p11 }
  0x22   :  { %p6499_p0 = pnand %p6498_p13, %p6492_p10 }
  0x24   :  { %6502 = shalt.err (!%p6499_p0)
}
  0x25   :  { %s6578_s9 = smov 384   ;;  %s6579_s10 = smov 24  }
  0x26   :  { %25 = dma.hbm_to_vmem [thread:$0]  %s6796_s0, 768, %s20_s8, [#allocation3], %s6578_s9, %s6578_s9, %s6579_s10  }
  0x27   :  { %s6580_s3 = smov [#allocation7]   ;;  %s6581_s14 = smov [#allocation10]  }
  0x28   :  { %s44_s13 = sshll.u32 %s6580_s3, 4  ;;  %s66_s15 = sshll.u32 %s6581_s14, 4  ;;  %s45_s13 = int_to_ptr.vmem [resolvable:$true] %s44_s13  ;;  %s67_s15 = int_to_ptr.vmem [resolvable:$true] %s66_s15 }
  0x29   :  { %s6511_s16 = scalar_lea.vmem %s45_s13, 192  ;;  %p6516_p2 = scmp.lt.s32.totalorder %s45_s13, %s45_s13 }
  0x2a   :  { %p6512_p1 = scmp.ne.s32.totalorder %s45_s13, %s6511_s16  ;;  %p6517_p3 = scmp.lt.s32.totalorder %s6511_s16, %s6511_s16 }
  0x2c   :  { %p6518_p4 = por %p6517_p3, %p6516_p2 }
  0x2e   :  { %p6519_p5 = pnand %p6518_p4, %p6512_p1 }
  0x30   :  { %6522 = shalt.err (!%p6519_p5)
}
  0x31   :  { %47 = dma.hbm_to_vmem [thread:$0]  %s6798_s2, 192, %s45_s13, [#allocation6]  }
  0x32   :  { %s6531_s19 = scalar_lea.vmem %s67_s15, 48  ;;  %s6535_s0 = scalar_lea.vmem %s67_s15, 64 }
  0x33   :  { %p6532_p6 = scmp.ne.s32.totalorder %s67_s15, %s6531_s19  ;;  %p6536_p7 = scmp.lt.s32.totalorder %s67_s15, %s67_s15 }
  0x34   :  { %p6537_p8 = scmp.lt.s32.totalorder %s6535_s0, %s6531_s19 }
  0x36   :  { %p6538_p9 = por %p6537_p8, %p6536_p7 }
  0x38   :  { %p6539_p10 = pnand %p6538_p9, %p6532_p6 }
  0x3a   :  { %6542 = shalt.err (!%p6539_p10)
}
  0x3b   :  { %69 = dma.hbm_to_vmem [thread:$0]  %s6800_s4, 48, %s67_s15, [#allocation9]  }
  0x3c   :  { %6563 = dma.done.wait [#allocation3], 768  }
  0x3d   :  { %6564 = vsyncadd [#allocation3], 4294966528 }
  0x3e   :  { %6565 = dma.done.wait [#allocation6], 37056  }
  0x3f   :  { %6566 = vsyncadd [#allocation6], 4294930240 }
  0x40   :  { %6567 = dma.done.wait [#allocation9], 36912  }
  0x41   :  { %6568 = vsyncadd [#allocation9], 4294930384  ;;  %v6582_v0 = vmov 0   ;;  %v5626_v1 = vld [vmem:[#allocation5 + $0x2a4] ss:$48 sps:$4 sm:$0xff]   ;;  %v91_v34 = vld [vmem:[#allocation2 + $0x28] sm:$0xff] }
  0x42   :  { %1962 = vmatprep.mubr.bf16.mxu1 %v6582_v0  ;;  %v5628_v2 = vld [vmem:[#allocation5 + $0x8a4] ss:$48 sps:$4 sm:$0xff]   ;;  %1887 = vmatprep.subr.bf16.mxu0 %v5626_v1  ;;  %v5630_v3 = vld [vmem:[#allocation5 + $0x2a0] ss:$48 sps:$4 sm:$0xff]   ;;  %v5678_v36 = vld [vmem:[#allocation5 + $0x2ac] ss:$48 sps:$4 sm:$0xff]  }
  0x43   :  { %v5631_v4 = vld [vmem:[#allocation5 + $0x8a0] ss:$48 sps:$4 sm:$0xff]   ;;  %1930 = vmatprep.subr.bf16.mxu1 %v5628_v2  ;;  %v5632_v5 = vld [vmem:[#allocation5 + $0x244] ss:$48 sps:$4 sm:$0xff]   ;;  %1888 = vmatpush1.bf16.msra.mxu0 %v5630_v3  ;;  %v5676_v38 = vld [vmem:[#allocation5 + $0x2a8] ss:$48 sps:$4 sm:$0xff]  }
  0x44   :  { %1931 = vmatpush1.bf16.msra.mxu1 %v5631_v4  ;;  %v5634_v6 = vld [vmem:[#allocation5 + $0x844] ss:$48 sps:$4 sm:$0xff]   ;;  %v5636_v7 = vld [vmem:[#allocation5 + $0x240] ss:$48 sps:$4 sm:$0xff]   ;;  %1889 = vmatprep.subr.bf16.mxu0 %v5632_v5  ;;  %v5684_v41 = vld [vmem:[#allocation5 + $0x24c] ss:$48 sps:$4 sm:$0xff]  }
  0x45   :  { %v5637_v8 = vld [vmem:[#allocation5 + $0x840] ss:$48 sps:$4 sm:$0xff]   ;;  %1932 = vmatprep.subr.bf16.mxu1 %v5634_v6  ;;  %v5638_v9 = vld [vmem:[#allocation5 + $0x1e4] ss:$48 sps:$4 sm:$0xff]   ;;  %v5682_v42 = vld [vmem:[#allocation5 + $0x248] ss:$48 sps:$4 sm:$0xff]  }
  0x46   :  { %v5640_v10 = vld [vmem:[#allocation5 + $0x7e4] ss:$48 sps:$4 sm:$0xff]   ;;  %v5642_v11 = vld [vmem:[#allocation5 + $0x1e0] ss:$48 sps:$4 sm:$0xff]   ;;  %v5690_v45 = vld [vmem:[#allocation5 + $0x1ec] ss:$48 sps:$4 sm:$0xff]  }
  0x47   :  { %v5643_v12 = vld [vmem:[#allocation5 + $0x7e0] ss:$48 sps:$4 sm:$0xff]   ;;  %1890 = vmatpush1.bf16.msra.mxu0 %v5636_v7  ;;  %v5644_v13 = vld [vmem:[#allocation5 + $0x184] ss:$48 sps:$4 sm:$0xff]   ;;  %v5688_v46 = vld [vmem:[#allocation5 + $0x1e8] ss:$48 sps:$4 sm:$0xff]  }
  0x48   :  { %1933 = vmatpush1.bf16.msra.mxu1 %v5637_v8  ;;  %1891 = vmatprep.subr.bf16.mxu0 %v5638_v9  ;;  %v5646_v14 = vld [vmem:[#allocation5 + $0x784] ss:$48 sps:$4 sm:$0xff]   ;;  %v5648_v15 = vld [vmem:[#allocation5 + $0x180] ss:$48 sps:$4 sm:$0xff]   ;;  %v5696_v49 = vld [vmem:[#allocation5 + $0x18c] ss:$48 sps:$4 sm:$0xff]  }
  0x49   :  { %1934 = vmatprep.subr.bf16.mxu1 %v5640_v10  ;;  %v5649_v16 = vld [vmem:[#allocation5 + $0x780] ss:$48 sps:$4 sm:$0xff]   ;;  %v5650_v17 = vld [vmem:[#allocation5 + $0x124] ss:$48 sps:$4 sm:$0xff]   ;;  %v87_v50 = vld [vmem:[#allocation2 + $0x8] sm:$0xff]  ;;  %s6583_s2 = smov [#allocation11]  }
  0x4a   :  { %v5652_v18 = vld [vmem:[#allocation5 + $0x724] ss:$48 sps:$4 sm:$0xff]   ;;  %v5654_v19 = vld [vmem:[#allocation5 + $0x120] ss:$48 sps:$4 sm:$0xff]   ;;  %v5694_v52 = vld [vmem:[#allocation5 + $0x188] ss:$48 sps:$4 sm:$0xff]  }
  0x4b   :  { %1892 = vmatpush1.bf16.msra.mxu0 %v5642_v11  ;;  %v5655_v20 = vld [vmem:[#allocation5 + $0x720] ss:$48 sps:$4 sm:$0xff]   ;;  %v5656_v21 = vld [vmem:[#allocation5 + $0xc4] ss:$48 sps:$4 sm:$0xff]   ;;  %v5702_v56 = vld [vmem:[#allocation5 + $0x12c] ss:$48 sps:$4 sm:$0xff]  }
  0x4c   :  { %1935 = vmatpush1.bf16.msra.mxu1 %v5643_v12  ;;  %1893 = vmatprep.subr.bf16.mxu0 %v5644_v13  ;;  %v5658_v22 = vld [vmem:[#allocation5 + $0x6c4] ss:$48 sps:$4 sm:$0xff]   ;;  %v5660_v23 = vld [vmem:[#allocation5 + $0xc0] ss:$48 sps:$4 sm:$0xff]   ;;  %v5700_v57 = vld [vmem:[#allocation5 + $0x128] ss:$48 sps:$4 sm:$0xff]  }
  0x4d   :  { %1936 = vmatprep.subr.bf16.mxu1 %v5646_v14  ;;  %v5661_v24 = vld [vmem:[#allocation5 + $0x6c0] ss:$48 sps:$4 sm:$0xff]   ;;  %v5662_v25 = vld [vmem:[#allocation5 + $0x64] ss:$48 sps:$4 sm:$0xff]   ;;  %v5708_v60 = vld [vmem:[#allocation5 + $0xcc] ss:$48 sps:$4 sm:$0xff]  }
  0x4e   :  { %v5664_v26 = vld [vmem:[#allocation5 + $0x664] ss:$48 sps:$4 sm:$0xff]   ;;  %v5666_v27 = vld [vmem:[#allocation5 + $0x60] ss:$48 sps:$4 sm:$0xff]   ;;  %v5706_v61 = vld [vmem:[#allocation5 + $0xc8] ss:$48 sps:$4 sm:$0xff]  }
  0x4f   :  { %1894 = vmatpush1.bf16.msra.mxu0 %v5648_v15  ;;  %v5667_v28 = vld [vmem:[#allocation5 + $0x660] ss:$48 sps:$4 sm:$0xff]   ;;  %v5668_v29 = vld [vmem:[#allocation5 + $0x4] ss:$48 sps:$4 sm:$0xff]   ;;  %v5714_v1 = vld [vmem:[#allocation5 + $0x6c] ss:$48 sps:$4 sm:$0xff]  }
  0x50   :  { %1937 = vmatpush1.bf16.msra.mxu1 %v5649_v16  ;;  %1895 = vmatprep.subr.bf16.mxu0 %v5650_v17  ;;  %v5670_v30 = vld [vmem:[#allocation5 + $0x604] ss:$48 sps:$4 sm:$0xff]   ;;  %v5672_v31 = vld [vmem:[#allocation5] ss:$48 sps:$4 sm:$0xff]   ;;  %v5712_v2 = vld [vmem:[#allocation5 + $0x68] ss:$48 sps:$4 sm:$0xff]  }
  0x51   :  { %1938 = vmatprep.subr.bf16.mxu1 %v5652_v18  ;;  %v5673_v32 = vld [vmem:[#allocation5 + $0x600] ss:$48 sps:$4 sm:$0xff]   ;;  %v5674_v35 = vld [vmem:[#allocation5 + $0x5a4] ss:$48 sps:$4 sm:$0xff]   ;;  %v5720_v5 = vld [vmem:[#allocation5 + $0xc] ss:$48 sps:$4 sm:$0xff]  }
  0x52   :  { %v88_v33 = vld [vmem:[#allocation2 + $0x10] sm:$0xff]  ;;  %v90_v51 = vld [vmem:[#allocation2 + $0x20] sm:$0xff]  ;;  %v5718_v6 = vld [vmem:[#allocation5 + $0x8] ss:$48 sps:$4 sm:$0xff]   ;;  %s4891_s4 = sshll.u32 %s6583_s2, 4  ;;  %s4892_s4 = int_to_ptr.vmem [resolvable:$true] %s4891_s4 }
  0x53   :  { %1896 = vmatpush1.bf16.msra.mxu0 %v5654_v19  ;;  %v6633_v37 = vpack.c.bf16 %v91_v34, %v88_v33  ;;  %v5679_v39 = vld [vmem:[#allocation5 + $0x5a0] ss:$48 sps:$4 sm:$0xff]   ;;  %v5680_v40 = vld [vmem:[#allocation5 + $0x544] ss:$48 sps:$4 sm:$0xff]   ;;  %v6636_v54 = vpack.c.bf16 %v90_v51, %v87_v50  ;;  %v89_v9 = vld [vmem:[#allocation2 + $0x18] sm:$0xff]  ;;  %s6543_s22 = scalar_lea.vmem %s4892_s4, 768  ;;  %p6548_p12 = scmp.lt.s32.totalorder %s4892_s4, %s4892_s4 }
  0x54   :  { %1939 = vmatpush1.bf16.msra.mxu1 %v5655_v20  ;;  %1897 = vmatprep.subr.bf16.mxu0 %v5656_v21  ;;  %v5685_v43 = vld [vmem:[#allocation5 + $0x540] ss:$48 sps:$4 sm:$0xff]   ;;  %v5686_v44 = vld [vmem:[#allocation5 + $0x4e4] ss:$48 sps:$4 sm:$0xff]   ;;  %v5724_v10 = vld [vmem:[#allocation5 + $0x5ac] ss:$48 sps:$4 sm:$0xff]   ;;  %p6544_p11 = scmp.ne.s32.totalorder %s4892_s4, %s6543_s22  ;;  %p6549_p13 = scmp.lt.s32.totalorder %s6543_s22, %s6543_s22 }
  0x55   :  { %1940 = vmatprep.subr.bf16.mxu1 %v5658_v22  ;;  %v5691_v47 = vld [vmem:[#allocation5 + $0x4e0] ss:$48 sps:$4 sm:$0xff]   ;;  %v5692_v48 = vld [vmem:[#allocation5 + $0x484] ss:$48 sps:$4 sm:$0xff]   ;;  %1919 = vmatprep.mubr.bf16.mxu0 %v6636_v54  ;;  %v5727_v11 = vld [vmem:[#allocation5 + $0x8ac] ss:$48 sps:$4 sm:$0xff]  }
  0x56   :  { %v5697_v53 = vld [vmem:[#allocation5 + $0x480] ss:$48 sps:$4 sm:$0xff]   ;;  %v5698_v55 = vld [vmem:[#allocation5 + $0x424] ss:$48 sps:$4 sm:$0xff]   ;;  %v5722_v13 = vld [vmem:[#allocation5 + $0x5a8] ss:$48 sps:$4 sm:$0xff]   ;;  %p6550_p0 = por %p6549_p13, %p6548_p12 }
  0x57   :  { %1898 = vmatpush1.bf16.msra.mxu0 %v5660_v23  ;;  %v5703_v58 = vld [vmem:[#allocation5 + $0x420] ss:$48 sps:$4 sm:$0xff]   ;;  %v5704_v59 = vld [vmem:[#allocation5 + $0x3c4] ss:$48 sps:$4 sm:$0xff]   ;;  %v5725_v14 = vld [vmem:[#allocation5 + $0x8a8] ss:$48 sps:$4 sm:$0xff]  }
  0x58   :  { %1941 = vmatpush1.bf16.msra.mxu1 %v5661_v24  ;;  %1899 = vmatprep.subr.bf16.mxu0 %v5662_v25  ;;  %v5709_v62 = vld [vmem:[#allocation5 + $0x3c0] ss:$48 sps:$4 sm:$0xff]   ;;  %v5710_v63 = vld [vmem:[#allocation5 + $0x364] ss:$48 sps:$4 sm:$0xff]   ;;  %v5730_v15 = vld [vmem:[#allocation5 + $0x54c] ss:$48 sps:$4 sm:$0xff]   ;;  %p6551_p1 = pnand %p6550_p0, %p6544_p11 }
  0x59   :  { %1942 = vmatprep.subr.bf16.mxu1 %v5664_v26  ;;  %v5715_v3 = vld [vmem:[#allocation5 + $0x360] ss:$48 sps:$4 sm:$0xff]   ;;  %v5716_v4 = vld [vmem:[#allocation5 + $0x304] ss:$48 sps:$4 sm:$0xff]   ;;  %v5733_v16 = vld [vmem:[#allocation5 + $0x84c] ss:$48 sps:$4 sm:$0xff]  }
  0x5a   :  { %v5721_v7 = vld [vmem:[#allocation5 + $0x300] ss:$48 sps:$4 sm:$0xff]   ;;  %v5728_v17 = vld [vmem:[#allocation5 + $0x548] ss:$48 sps:$4 sm:$0xff]   ;;  %v5736_v19 = vld [vmem:[#allocation5 + $0x4ec] ss:$48 sps:$4 sm:$0xff]  }
  0x5b   :  { %1900 = vmatpush1.bf16.msra.mxu0 %v5666_v27  ;;  %v86_v8 = vld [vmem:[#allocation2] sm:$0xff]  ;;  %v5731_v18 = vld [vmem:[#allocation5 + $0x848] ss:$48 sps:$4 sm:$0xff]   ;;  %v5739_v20 = vld [vmem:[#allocation5 + $0x7ec] ss:$48 sps:$4 sm:$0xff]  }
  0x5c   :  { %1943 = vmatpush1.bf16.msra.mxu1 %v5667_v28  ;;  %1901 = vmatprep.subr.bf16.mxu0 %v5668_v29  ;;  %v6640_v12 = vpack.c.bf16 %v89_v9, %v86_v8  ;;  %v5734_v21 = vld [vmem:[#allocation5 + $0x4e8] ss:$48 sps:$4 sm:$0xff]   ;;  %v5742_v23 = vld [vmem:[#allocation5 + $0x48c] ss:$48 sps:$4 sm:$0xff]   ;;  %v5776_v50 = vld [vmem:[#allocation5 + $0x250] ss:$48 sps:$4 sm:$0xff]  }
  0x5d   :  { %1944 = vmatprep.subr.bf16.mxu1 %v5670_v30  ;;  %v5737_v22 = vld [vmem:[#allocation5 + $0x7e8] ss:$48 sps:$4 sm:$0xff]   ;;  %v5745_v24 = vld [vmem:[#allocation5 + $0x78c] ss:$48 sps:$4 sm:$0xff]   ;;  %v5779_v51 = vld [vmem:[#allocation5 + $0x850] ss:$48 sps:$4 sm:$0xff]  }
  0x5e   :  { %v5740_v25 = vld [vmem:[#allocation5 + $0x488] ss:$48 sps:$4 sm:$0xff]   ;;  %v5748_v27 = vld [vmem:[#allocation5 + $0x42c] ss:$48 sps:$4 sm:$0xff]   ;;  %v5806_v8 = vld [vmem:[#allocation5 + $0x70] ss:$48 sps:$4 sm:$0xff]  }
  0x5f   :  { %1902 = vmatpush1.bf16.msra.mxu0 %v5672_v31  ;;  %v5743_v26 = vld [vmem:[#allocation5 + $0x788] ss:$48 sps:$4 sm:$0xff]   ;;  %v5751_v28 = vld [vmem:[#allocation5 + $0x72c] ss:$48 sps:$4 sm:$0xff]   ;;  %v5809_v9 = vld [vmem:[#allocation5 + $0x670] ss:$48 sps:$4 sm:$0xff]  }
  0x60   :  { %1945 = vmatpush1.bf16.msra.mxu1 %v5673_v32  ;;  %1903 = vmatprep.subr.bf16.mxu0 %v5674_v35  ;;  %v5746_v29 = vld [vmem:[#allocation5 + $0x428] ss:$48 sps:$4 sm:$0xff]   ;;  %v5754_v31 = vld [vmem:[#allocation5 + $0x3cc] ss:$48 sps:$4 sm:$0xff]  }
  0x61   :  { %1973 = vmatprep.subr.bf16.mxu1 %v5678_v36  ;;  %v5749_v30 = vld [vmem:[#allocation5 + $0x728] ss:$48 sps:$4 sm:$0xff]   ;;  %v5757_v32 = vld [vmem:[#allocation5 + $0x6cc] ss:$48 sps:$4 sm:$0xff]  }
  0x62   :  { %v5752_v33 = vld [vmem:[#allocation5 + $0x3c8] ss:$48 sps:$4 sm:$0xff]   ;;  %v5760_v35 = vld [vmem:[#allocation5 + $0x36c] ss:$48 sps:$4 sm:$0xff]  }
  0x63   :  { %1963 = vmatmul.mubr.bf16.vlgmr.msra.gmra.mxu1 %v6633_v37  ;;  %1904 = vmatpush2.bf16.msra.mxu0 %v5679_v39  ;;  %v5755_v34 = vld [vmem:[#allocation5 + $0x6c8] ss:$48 sps:$4 sm:$0xff]   ;;  %v5763_v36 = vld [vmem:[#allocation5 + $0x66c] ss:$48 sps:$4 sm:$0xff]  }
  0x64   :  { %1974 = vmatpush1.bf16.msra.mxu1 %v5676_v38  ;;  %1905 = vmatprep.subr.bf16.mxu0 %v5680_v40  ;;  %v5758_v38 = vld [vmem:[#allocation5 + $0x368] ss:$48 sps:$4 sm:$0xff]   ;;  %v5766_v40 = vld [vmem:[#allocation5 + $0x30c] ss:$48 sps:$4 sm:$0xff]  }
  0x65   :  { %1975 = vmatprep.subr.bf16.mxu1 %v5684_v41  ;;  %2005 = vmatprep.mubr.bf16.mxu1 %v6636_v54  ;;  %v5761_v39 = vld [vmem:[#allocation5 + $0x668] ss:$48 sps:$4 sm:$0xff]   ;;  %v5769_v41 = vld [vmem:[#allocation5 + $0x60c] ss:$48 sps:$4 sm:$0xff]  }
  0x67   :  { %1906 = vmatpush2.bf16.msra.mxu0 %v5685_v43  ;;  %v5767_v43 = vld [vmem:[#allocation5 + $0x608] ss:$48 sps:$4 sm:$0xff]  }
  0x68   :  { %1976 = vmatpush1.bf16.msra.mxu1 %v5682_v42  ;;  %1907 = vmatprep.subr.bf16.mxu0 %v5686_v44  ;;  %v5764_v42 = vld [vmem:[#allocation5 + $0x308] ss:$48 sps:$4 sm:$0xff]   ;;  %v5772_v44 = vld [vmem:[#allocation5 + $0x2b4] ss:$48 sps:$4 sm:$0xff]  }
  0x69   :  { %1977 = vmatprep.subr.bf16.mxu1 %v5690_v45  ;;  %v5775_v45 = vld [vmem:[#allocation5 + $0x8b4] ss:$48 sps:$4 sm:$0xff]  }
  0x6b   :  { %1908 = vmatpush2.bf16.msra.mxu0 %v5691_v47  ;;  %v5773_v47 = vld [vmem:[#allocation5 + $0x8b0] ss:$48 sps:$4 sm:$0xff]  }
  0x6c   :  { %1978 = vmatpush1.bf16.msra.mxu1 %v5688_v46  ;;  %1909 = vmatprep.subr.bf16.mxu0 %v5692_v48  ;;  %v5770_v46 = vld [vmem:[#allocation5 + $0x2b0] ss:$48 sps:$4 sm:$0xff]   ;;  %v5778_v48 = vld [vmem:[#allocation5 + $0x254] ss:$48 sps:$4 sm:$0xff]  }
  0x6d   :  { %1979 = vmatprep.subr.bf16.mxu1 %v5696_v49  ;;  %v5781_v49 = vld [vmem:[#allocation5 + $0x854] ss:$48 sps:$4 sm:$0xff]  }
  0x6f   :  { %1910 = vmatpush2.bf16.msra.mxu0 %v5697_v53  ;;  %v5787_v53 = vld [vmem:[#allocation5 + $0x7f4] ss:$48 sps:$4 sm:$0xff]  }
  0x70   :  { %1980 = vmatpush1.bf16.msra.mxu1 %v5694_v52  ;;  %1911 = vmatprep.subr.bf16.mxu0 %v5698_v55  ;;  %v5784_v52 = vld [vmem:[#allocation5 + $0x1f4] ss:$48 sps:$4 sm:$0xff]   ;;  %v5782_v55 = vld [vmem:[#allocation5 + $0x1f0] ss:$48 sps:$4 sm:$0xff]  }
  0x71   :  { %1981 = vmatprep.subr.bf16.mxu1 %v5702_v56  ;;  %v5785_v56 = vld [vmem:[#allocation5 + $0x7f0] ss:$48 sps:$4 sm:$0xff]  }
  0x73   :  { %1912 = vmatpush2.bf16.msra.mxu0 %v5703_v58  ;;  %v5793_v58 = vld [vmem:[#allocation5 + $0x794] ss:$48 sps:$4 sm:$0xff]  }
  0x74   :  { %1982 = vmatpush1.bf16.msra.mxu1 %v5700_v57  ;;  %1913 = vmatprep.subr.bf16.mxu0 %v5704_v59  ;;  %v5790_v57 = vld [vmem:[#allocation5 + $0x194] ss:$48 sps:$4 sm:$0xff]   ;;  %v5788_v59 = vld [vmem:[#allocation5 + $0x190] ss:$48 sps:$4 sm:$0xff]  }
  0x75   :  { %1983 = vmatprep.subr.bf16.mxu1 %v5708_v60  ;;  %v5791_v60 = vld [vmem:[#allocation5 + $0x790] ss:$48 sps:$4 sm:$0xff]  }
  0x77   :  { %1914 = vmatpush2.bf16.msra.mxu0 %v5709_v62  ;;  %v5799_v62 = vld [vmem:[#allocation5 + $0x734] ss:$48 sps:$4 sm:$0xff]  }
  0x78   :  { %1984 = vmatpush1.bf16.msra.mxu1 %v5706_v61  ;;  %1915 = vmatprep.subr.bf16.mxu0 %v5710_v63  ;;  %v5796_v61 = vld [vmem:[#allocation5 + $0x134] ss:$48 sps:$4 sm:$0xff]   ;;  %v5794_v63 = vld [vmem:[#allocation5 + $0x130] ss:$48 sps:$4 sm:$0xff]  }
  0x79   :  { %1985 = vmatprep.subr.bf16.mxu1 %v5714_v1  ;;  %v5797_v1 = vld [vmem:[#allocation5 + $0x730] ss:$48 sps:$4 sm:$0xff]  }
  0x7b   :  { %1916 = vmatpush2.bf16.msra.mxu0 %v5715_v3  ;;  %v5805_v3 = vld [vmem:[#allocation5 + $0x6d4] ss:$48 sps:$4 sm:$0xff]  }
  0x7c   :  { %1986 = vmatpush1.bf16.msra.mxu1 %v5712_v2  ;;  %1917 = vmatprep.subr.bf16.mxu0 %v5716_v4  ;;  %v5802_v2 = vld [vmem:[#allocation5 + $0xd4] ss:$48 sps:$4 sm:$0xff]   ;;  %v5800_v4 = vld [vmem:[#allocation5 + $0xd0] ss:$48 sps:$4 sm:$0xff]  }
  0x7d   :  { %1987 = vmatprep.subr.bf16.mxu1 %v5720_v5  ;;  %v5803_v5 = vld [vmem:[#allocation5 + $0x6d0] ss:$48 sps:$4 sm:$0xff]  }
  0x7f   :  { %1918 = vmatpush2.bf16.msra.mxu0 %v5721_v7  ;;  %v5811_v7 = vld [vmem:[#allocation5 + $0x674] ss:$48 sps:$4 sm:$0xff]  }
  0x80   :  { %1988 = vmatpush1.bf16.msra.mxu1 %v5718_v6  ;;  %2016 = vmatprep.subr.bf16.mxu0 %v5727_v11  ;;  %v5808_v6 = vld [vmem:[#allocation5 + $0x74] ss:$48 sps:$4 sm:$0xff]  }
  0x81   :  { %1989 = vmatprep.subr.bf16.mxu1 %v5724_v10  ;;  %v5814_v10 = vld [vmem:[#allocation5 + $0x14] ss:$48 sps:$4 sm:$0xff]  }
  0x82   :  { %1920 = vmatmul.mubr.bf16.vlgmr.msra.gmra.mxu0 %v6640_v12  ;;  %v5817_v11 = vld [vmem:[#allocation5 + $0x614] ss:$48 sps:$4 sm:$0xff]  }
  0x83   :  { %2017 = vmatpush1.bf16.msra.mxu0 %v5725_v14  ;;  %2048 = vmatprep.mubr.bf16.mxu0 %v6582_v0  ;;  %v5815_v14 = vld [vmem:[#allocation5 + $0x610] ss:$48 sps:$4 sm:$0xff]  }
  0x84   :  { %1990 = vmatpush2.bf16.msra.mxu1 %v5722_v13  ;;  %2018 = vmatprep.subr.bf16.mxu0 %v5733_v16  ;;  %v5812_v13 = vld [vmem:[#allocation5 + $0x10] ss:$48 sps:$4 sm:$0xff]   ;;  %v5823_v16 = vld [vmem:[#allocation5 + $0x2bc] ss:$48 sps:$4 sm:$0xff]  }
  0x85   :  { %1991 = vmatprep.subr.bf16.mxu1 %v5730_v15  ;;  %v5820_v15 = vld [vmem:[#allocation5 + $0x5b4] ss:$48 sps:$4 sm:$0xff]  }
  0x87   :  { %2019 = vmatpush1.bf16.msra.mxu0 %v5731_v18  ;;  %v5821_v18 = vld [vmem:[#allocation5 + $0x2b8] ss:$48 sps:$4 sm:$0xff]  }
  0x88   :  { %1992 = vmatpush2.bf16.msra.mxu1 %v5728_v17  ;;  %2020 = vmatprep.subr.bf16.mxu0 %v5739_v20  ;;  %v5818_v17 = vld [vmem:[#allocation5 + $0x5b0] ss:$48 sps:$4 sm:$0xff]   ;;  %v5829_v20 = vld [vmem:[#allocation5 + $0x25c] ss:$48 sps:$4 sm:$0xff]  }
  0x89   :  { %1993 = vmatprep.subr.bf16.mxu1 %v5736_v19  ;;  %v5826_v19 = vld [vmem:[#allocation5 + $0x554] ss:$48 sps:$4 sm:$0xff]  }
  0x8b   :  { %2021 = vmatpush1.bf16.msra.mxu0 %v5737_v22  ;;  %v5827_v22 = vld [vmem:[#allocation5 + $0x258] ss:$48 sps:$4 sm:$0xff]  }
  0x8c   :  { %1994 = vmatpush2.bf16.msra.mxu1 %v5734_v21  ;;  %2022 = vmatprep.subr.bf16.mxu0 %v5745_v24  ;;  %v5824_v21 = vld [vmem:[#allocation5 + $0x550] ss:$48 sps:$4 sm:$0xff]   ;;  %v5835_v24 = vld [vmem:[#allocation5 + $0x1fc] ss:$48 sps:$4 sm:$0xff]  }
  0x8d   :  { %1995 = vmatprep.subr.bf16.mxu1 %v5742_v23  ;;  %v5832_v23 = vld [vmem:[#allocation5 + $0x4f4] ss:$48 sps:$4 sm:$0xff]  }
  0x8f   :  { %2023 = vmatpush1.bf16.msra.mxu0 %v5743_v26  ;;  %v5833_v26 = vld [vmem:[#allocation5 + $0x1f8] ss:$48 sps:$4 sm:$0xff]  }
  0x90   :  { %1996 = vmatpush2.bf16.msra.mxu1 %v5740_v25  ;;  %2024 = vmatprep.subr.bf16.mxu0 %v5751_v28  ;;  %v5830_v25 = vld [vmem:[#allocation5 + $0x4f0] ss:$48 sps:$4 sm:$0xff]   ;;  %v5841_v28 = vld [vmem:[#allocation5 + $0x19c] ss:$48 sps:$4 sm:$0xff]  }
  0x91   :  { %1997 = vmatprep.subr.bf16.mxu1 %v5748_v27  ;;  %v5838_v27 = vld [vmem:[#allocation5 + $0x494] ss:$48 sps:$4 sm:$0xff]  }
  0x93   :  { %2025 = vmatpush1.bf16.msra.mxu0 %v5749_v30  ;;  %v5839_v30 = vld [vmem:[#allocation5 + $0x198] ss:$48 sps:$4 sm:$0xff]  }
  0x94   :  { %1998 = vmatpush2.bf16.msra.mxu1 %v5746_v29  ;;  %2026 = vmatprep.subr.bf16.mxu0 %v5757_v32  ;;  %v5836_v29 = vld [vmem:[#allocation5 + $0x490] ss:$48 sps:$4 sm:$0xff]   ;;  %v5847_v32 = vld [vmem:[#allocation5 + $0x13c] ss:$48 sps:$4 sm:$0xff]  }
  0x95   :  { %1999 = vmatprep.subr.bf16.mxu1 %v5754_v31  ;;  %v5844_v31 = vld [vmem:[#allocation5 + $0x434] ss:$48 sps:$4 sm:$0xff]  }
  0x97   :  { %2027 = vmatpush1.bf16.msra.mxu0 %v5755_v34  ;;  %v5845_v34 = vld [vmem:[#allocation5 + $0x138] ss:$48 sps:$4 sm:$0xff]  }
  0x98   :  { %2000 = vmatpush2.bf16.msra.mxu1 %v5752_v33  ;;  %2028 = vmatprep.subr.bf16.mxu0 %v5763_v36  ;;  %v5842_v33 = vld [vmem:[#allocation5 + $0x430] ss:$48 sps:$4 sm:$0xff]   ;;  %v5853_v36 = vld [vmem:[#allocation5 + $0xdc] ss:$48 sps:$4 sm:$0xff]  }
  0x99   :  { %2001 = vmatprep.subr.bf16.mxu1 %v5760_v35  ;;  %v5850_v35 = vld [vmem:[#allocation5 + $0x3d4] ss:$48 sps:$4 sm:$0xff]  }
  0x9b   :  { %2029 = vmatpush1.bf16.msra.mxu0 %v5761_v39  ;;  %v5851_v39 = vld [vmem:[#allocation5 + $0xd8] ss:$48 sps:$4 sm:$0xff]  }
  0x9c   :  { %2002 = vmatpush2.bf16.msra.mxu1 %v5758_v38  ;;  %2030 = vmatprep.subr.bf16.mxu0 %v5769_v41  ;;  %v5848_v38 = vld [vmem:[#allocation5 + $0x3d0] ss:$48 sps:$4 sm:$0xff]   ;;  %v5859_v41 = vld [vmem:[#allocation5 + $0x7c] ss:$48 sps:$4 sm:$0xff]  }
  0x9d   :  { %2003 = vmatprep.subr.bf16.mxu1 %v5766_v40  ;;  %v5856_v40 = vld [vmem:[#allocation5 + $0x374] ss:$48 sps:$4 sm:$0xff]  }
  0x9f   :  { %2031 = vmatpush1.bf16.msra.mxu0 %v5767_v43  ;;  %v5857_v43 = vld [vmem:[#allocation5 + $0x78] ss:$48 sps:$4 sm:$0xff]  }
  0xa0   :  { %2004 = vmatpush2.bf16.msra.mxu1 %v5764_v42  ;;  %2059 = vmatprep.subr.bf16.mxu0 %v5772_v44  ;;  %v5854_v42 = vld [vmem:[#allocation5 + $0x370] ss:$48 sps:$4 sm:$0xff]   ;;  %v5862_v44 = vld [vmem:[#allocation5 + $0x314] ss:$48 sps:$4 sm:$0xff]  }
  0xa1   :  { %2102 = vmatprep.subr.bf16.mxu1 %v5775_v45  ;;  %v5865_v45 = vld [vmem:[#allocation5 + $0x1c] ss:$48 sps:$4 sm:$0xff]  }
  0xa2   :  { %2049 = vmatmul.mubr.bf16.vlgmr.msra.gmra.mxu0 %v6633_v37 }
  0xa3   :  { %2006 = vmatmul.mubr.bf16.vlgmr.msra.gmra.mxu1 %v6640_v12  ;;  %2060 = vmatpush1.bf16.msra.mxu0 %v5770_v46  ;;  %v5860_v46 = vld [vmem:[#allocation5 + $0x310] ss:$48 sps:$4 sm:$0xff]  }
  0xa4   :  { %2103 = vmatpush1.bf16.msra.mxu1 %v5773_v47  ;;  %2061 = vmatprep.subr.bf16.mxu0 %v5778_v48  ;;  %v5863_v47 = vld [vmem:[#allocation5 + $0x18] ss:$48 sps:$4 sm:$0xff]   ;;  %v5868_v48 = vld [vmem:[#allocation5 + $0x5bc] ss:$48 sps:$4 sm:$0xff]  }
  0xa5   :  { %2104 = vmatprep.subr.bf16.mxu1 %v5781_v49  ;;  %2134 = vmatprep.mubr.bf16.mxu1 %v6582_v0  ;;  %v5871_v49 = vld [vmem:[#allocation5 + $0x8bc] ss:$48 sps:$4 sm:$0xff]  }
  0xa6   :  { %2091 = vmatprep.mubr.bf16.mxu0 %v6636_v54 }
  0xa7   :  { %2062 = vmatpush1.bf16.msra.mxu0 %v5776_v50  ;;  %v5866_v50 = vld [vmem:[#allocation5 + $0x5b8] ss:$48 sps:$4 sm:$0xff]  }
  0xa8   :  { %2105 = vmatpush1.bf16.msra.mxu1 %v5779_v51  ;;  %2063 = vmatprep.subr.bf16.mxu0 %v5784_v52  ;;  %v5869_v51 = vld [vmem:[#allocation5 + $0x8b8] ss:$48 sps:$4 sm:$0xff]   ;;  %v5874_v52 = vld [vmem:[#allocation5 + $0x55c] ss:$48 sps:$4 sm:$0xff]  }
  0xa9   :  { %2106 = vmatprep.subr.bf16.mxu1 %v5787_v53  ;;  %v5877_v53 = vld [vmem:[#allocation5 + $0x85c] ss:$48 sps:$4 sm:$0xff]  }
  0xab   :  { %2064 = vmatpush1.bf16.msra.mxu0 %v5782_v55  ;;  %v5872_v55 = vld [vmem:[#allocation5 + $0x558] ss:$48 sps:$4 sm:$0xff]  }
  0xac   :  { %2107 = vmatpush1.bf16.msra.mxu1 %v5785_v56  ;;  %2065 = vmatprep.subr.bf16.mxu0 %v5790_v57  ;;  %v5875_v56 = vld [vmem:[#allocation5 + $0x858] ss:$48 sps:$4 sm:$0xff]   ;;  %v5880_v57 = vld [vmem:[#allocation5 + $0x4fc] ss:$48 sps:$4 sm:$0xff]  }
  0xad   :  { %2108 = vmatprep.subr.bf16.mxu1 %v5793_v58  ;;  %v5883_v58 = vld [vmem:[#allocation5 + $0x7fc] ss:$48 sps:$4 sm:$0xff]  }
  0xaf   :  { %2066 = vmatpush1.bf16.msra.mxu0 %v5788_v59  ;;  %v5878_v59 = vld [vmem:[#allocation5 + $0x4f8] ss:$48 sps:$4 sm:$0xff]  }
  0xb0   :  { %2109 = vmatpush1.bf16.msra.mxu1 %v5791_v60  ;;  %2067 = vmatprep.subr.bf16.mxu0 %v5796_v61  ;;  %v5881_v60 = vld [vmem:[#allocation5 + $0x7f8] ss:$48 sps:$4 sm:$0xff]   ;;  %v5886_v61 = vld [vmem:[#allocation5 + $0x49c] ss:$48 sps:$4 sm:$0xff]  }
  0xb1   :  { %2110 = vmatprep.subr.bf16.mxu1 %v5799_v62  ;;  %v5889_v62 = vld [vmem:[#allocation5 + $0x79c] ss:$48 sps:$4 sm:$0xff]  }
  0xb3   :  { %2068 = vmatpush1.bf16.msra.mxu0 %v5794_v63  ;;  %v5884_v63 = vld [vmem:[#allocation5 + $0x498] ss:$48 sps:$4 sm:$0xff]  }
  0xb4   :  { %2111 = vmatpush1.bf16.msra.mxu1 %v5797_v1  ;;  %2069 = vmatprep.subr.bf16.mxu0 %v5802_v2  ;;  %v5887_v1 = vld [vmem:[#allocation5 + $0x798] ss:$48 sps:$4 sm:$0xff]   ;;  %v5892_v2 = vld [vmem:[#allocation5 + $0x43c] ss:$48 sps:$4 sm:$0xff]  }
  0xb5   :  { %2112 = vmatprep.subr.bf16.mxu1 %v5805_v3  ;;  %v5895_v3 = vld [vmem:[#allocation5 + $0x73c] ss:$48 sps:$4 sm:$0xff]  }
  0xb7   :  { %2070 = vmatpush1.bf16.msra.mxu0 %v5800_v4  ;;  %v5890_v4 = vld [vmem:[#allocation5 + $0x438] ss:$48 sps:$4 sm:$0xff]  }
  0xb8   :  { %2113 = vmatpush1.bf16.msra.mxu1 %v5803_v5  ;;  %2071 = vmatprep.subr.bf16.mxu0 %v5808_v6  ;;  %v5893_v5 = vld [vmem:[#allocation5 + $0x738] ss:$48 sps:$4 sm:$0xff]   ;;  %v5898_v6 = vld [vmem:[#allocation5 + $0x3dc] ss:$48 sps:$4 sm:$0xff]  }
  0xb9   :  { %2114 = vmatprep.subr.bf16.mxu1 %v5811_v7  ;;  %v5901_v7 = vld [vmem:[#allocation5 + $0x6dc] ss:$48 sps:$4 sm:$0xff]  }
  0xbb   :  { %2072 = vmatpush1.bf16.msra.mxu0 %v5806_v8  ;;  %v5896_v8 = vld [vmem:[#allocation5 + $0x3d8] ss:$48 sps:$4 sm:$0xff]  }
  0xbc   :  { %2115 = vmatpush1.bf16.msra.mxu1 %v5809_v9  ;;  %2073 = vmatprep.subr.bf16.mxu0 %v5814_v10  ;;  %v5899_v9 = vld [vmem:[#allocation5 + $0x6d8] ss:$48 sps:$4 sm:$0xff]   ;;  %v5904_v10 = vld [vmem:[#allocation5 + $0x37c] ss:$48 sps:$4 sm:$0xff]  }
  0xbd   :  { %2116 = vmatprep.subr.bf16.mxu1 %v5817_v11  ;;  %v5907_v11 = vld [vmem:[#allocation5 + $0x67c] ss:$48 sps:$4 sm:$0xff]  }
  0xbf   :  { %2074 = vmatpush1.bf16.msra.mxu0 %v5812_v13  ;;  %v5902_v13 = vld [vmem:[#allocation5 + $0x378] ss:$48 sps:$4 sm:$0xff]  }
  0xc0   :  { %2117 = vmatpush1.bf16.msra.mxu1 %v5815_v14  ;;  %2075 = vmatprep.subr.bf16.mxu0 %v5820_v15  ;;  %v5905_v14 = vld [vmem:[#allocation5 + $0x678] ss:$48 sps:$4 sm:$0xff]   ;;  %v5910_v15 = vld [vmem:[#allocation5 + $0x31c] ss:$48 sps:$4 sm:$0xff]  }
  0xc1   :  { %2145 = vmatprep.subr.bf16.mxu1 %v5823_v16  ;;  %v5913_v16 = vld [vmem:[#allocation5 + $0x61c] ss:$48 sps:$4 sm:$0xff]  }
  0xc3   :  { %2135 = vmatmul.mubr.bf16.vlgmr.msra.gmra.mxu1 %v6633_v37  ;;  %2076 = vmatpush2.bf16.msra.mxu0 %v5818_v17  ;;  %v5908_v17 = vld [vmem:[#allocation5 + $0x318] ss:$48 sps:$4 sm:$0xff]  }
  0xc4   :  { %2146 = vmatpush1.bf16.msra.mxu1 %v5821_v18  ;;  %2077 = vmatprep.subr.bf16.mxu0 %v5826_v19  ;;  %v5911_v18 = vld [vmem:[#allocation5 + $0x618] ss:$48 sps:$4 sm:$0xff]   ;;  %v5916_v19 = vld [vmem:[#allocation5 + $0x2c4] ss:$48 sps:$4 sm:$0xff]  }
  0xc5   :  { %2147 = vmatprep.subr.bf16.mxu1 %v5829_v20  ;;  %2177 = vmatprep.mubr.bf16.mxu1 %v6636_v54  ;;  %v5919_v20 = vld [vmem:[#allocation5 + $0x8c4] ss:$48 sps:$4 sm:$0xff]  }
  0xc7   :  { %2078 = vmatpush2.bf16.msra.mxu0 %v5824_v21  ;;  %v5914_v21 = vld [vmem:[#allocation5 + $0x2c0] ss:$48 sps:$4 sm:$0xff]  }
  0xc8   :  { %2148 = vmatpush1.bf16.msra.mxu1 %v5827_v22  ;;  %2079 = vmatprep.subr.bf16.mxu0 %v5832_v23  ;;  %v5917_v22 = vld [vmem:[#allocation5 + $0x8c0] ss:$48 sps:$4 sm:$0xff]   ;;  %v5922_v23 = vld [vmem:[#allocation5 + $0x264] ss:$48 sps:$4 sm:$0xff]  }
  0xc9   :  { %2149 = vmatprep.subr.bf16.mxu1 %v5835_v24  ;;  %v5925_v24 = vld [vmem:[#allocation5 + $0x864] ss:$48 sps:$4 sm:$0xff]  }
  0xcb   :  { %2080 = vmatpush2.bf16.msra.mxu0 %v5830_v25  ;;  %v5920_v25 = vld [vmem:[#allocation5 + $0x260] ss:$48 sps:$4 sm:$0xff]  }
  0xcc   :  { %2150 = vmatpush1.bf16.msra.mxu1 %v5833_v26  ;;  %2081 = vmatprep.subr.bf16.mxu0 %v5838_v27  ;;  %v5923_v26 = vld [vmem:[#allocation5 + $0x860] ss:$48 sps:$4 sm:$0xff]   ;;  %v5928_v27 = vld [vmem:[#allocation5 + $0x204] ss:$48 sps:$4 sm:$0xff]  }
  0xcd   :  { %2151 = vmatprep.subr.bf16.mxu1 %v5841_v28  ;;  %v5931_v28 = vld [vmem:[#allocation5 + $0x804] ss:$48 sps:$4 sm:$0xff]  }
  0xcf   :  { %2082 = vmatpush2.bf16.msra.mxu0 %v5836_v29  ;;  %v5926_v29 = vld [vmem:[#allocation5 + $0x200] ss:$48 sps:$4 sm:$0xff]  }
  0xd0   :  { %2152 = vmatpush1.bf16.msra.mxu1 %v5839_v30  ;;  %2083 = vmatprep.subr.bf16.mxu0 %v5844_v31  ;;  %v5929_v30 = vld [vmem:[#allocation5 + $0x800] ss:$48 sps:$4 sm:$0xff]   ;;  %v5934_v31 = vld [vmem:[#allocation5 + $0x1a4] ss:$48 sps:$4 sm:$0xff]  }
  0xd1   :  { %2153 = vmatprep.subr.bf16.mxu1 %v5847_v32  ;;  %v5937_v32 = vld [vmem:[#allocation5 + $0x7a4] ss:$48 sps:$4 sm:$0xff]  }
  0xd3   :  { %2084 = vmatpush2.bf16.msra.mxu0 %v5842_v33  ;;  %v5932_v33 = vld [vmem:[#allocation5 + $0x1a0] ss:$48 sps:$4 sm:$0xff]  }
  0xd4   :  { %2154 = vmatpush1.bf16.msra.mxu1 %v5845_v34  ;;  %2085 = vmatprep.subr.bf16.mxu0 %v5850_v35  ;;  %v5935_v34 = vld [vmem:[#allocation5 + $0x7a0] ss:$48 sps:$4 sm:$0xff]   ;;  %v5940_v35 = vld [vmem:[#allocation5 + $0x144] ss:$48 sps:$4 sm:$0xff]  }
  0xd5   :  { %2155 = vmatprep.subr.bf16.mxu1 %v5853_v36  ;;  %v5943_v36 = vld [vmem:[#allocation5 + $0x744] ss:$48 sps:$4 sm:$0xff]  }
  0xd7   :  { %2086 = vmatpush2.bf16.msra.mxu0 %v5848_v38  ;;  %v5938_v38 = vld [vmem:[#allocation5 + $0x140] ss:$48 sps:$4 sm:$0xff]  }
  0xd8   :  { %2156 = vmatpush1.bf16.msra.mxu1 %v5851_v39  ;;  %2087 = vmatprep.subr.bf16.mxu0 %v5856_v40  ;;  %v5941_v39 = vld [vmem:[#allocation5 + $0x740] ss:$48 sps:$4 sm:$0xff]   ;;  %v5946_v40 = vld [vmem:[#allocation5 + $0xe4] ss:$48 sps:$4 sm:$0xff]  }
  0xd9   :  { %2157 = vmatprep.subr.bf16.mxu1 %v5859_v41  ;;  %v5949_v41 = vld [vmem:[#allocation5 + $0x6e4] ss:$48 sps:$4 sm:$0xff]  }
  0xdb   :  { %2088 = vmatpush2.bf16.msra.mxu0 %v5854_v42  ;;  %v5944_v42 = vld [vmem:[#allocation5 + $0xe0] ss:$48 sps:$4 sm:$0xff]  }
  0xdc   :  { %2158 = vmatpush1.bf16.msra.mxu1 %v5857_v43  ;;  %2089 = vmatprep.subr.bf16.mxu0 %v5862_v44  ;;  %v5947_v43 = vld [vmem:[#allocation5 + $0x6e0] ss:$48 sps:$4 sm:$0xff]   ;;  %v5952_v44 = vld [vmem:[#allocation5 + $0x84] ss:$48 sps:$4 sm:$0xff]  }
  0xdd   :  { %2159 = vmatprep.subr.bf16.mxu1 %v5865_v45  ;;  %v5955_v45 = vld [vmem:[#allocation5 + $0x684] ss:$48 sps:$4 sm:$0xff]  }
  0xdf   :  { %2090 = vmatpush2.bf16.msra.mxu0 %v5860_v46  ;;  %v5950_v46 = vld [vmem:[#allocation5 + $0x80] ss:$48 sps:$4 sm:$0xff]  }
  0xe0   :  { %2160 = vmatpush1.bf16.msra.mxu1 %v5863_v47  ;;  %2188 = vmatprep.subr.bf16.mxu0 %v5871_v49  ;;  %v5953_v47 = vld [vmem:[#allocation5 + $0x680] ss:$48 sps:$4 sm:$0xff]   ;;  %v5961_v49 = vld [vmem:[#allocation5 + $0x624] ss:$48 sps:$4 sm:$0xff]  }
  0xe1   :  { %2161 = vmatprep.subr.bf16.mxu1 %v5868_v48  ;;  %v5958_v48 = vld [vmem:[#allocation5 + $0x24] ss:$48 sps:$4 sm:$0xff]  }
  0xe2   :  { %2092 = vmatmul.mubr.bf16.vlgmr.msra.gmra.mxu0 %v6640_v12 }
  0xe3   :  { %2189 = vmatpush1.bf16.msra.mxu0 %v5869_v51  ;;  %2220 = vmatprep.mubr.bf16.mxu0 %v6582_v0  ;;  %v5959_v51 = vld [vmem:[#allocation5 + $0x620] ss:$48 sps:$4 sm:$0xff]  }
  0xe4   :  { %2162 = vmatpush2.bf16.msra.mxu1 %v5866_v50  ;;  %2190 = vmatprep.subr.bf16.mxu0 %v5877_v53  ;;  %v5956_v50 = vld [vmem:[#allocation5 + $0x20] ss:$48 sps:$4 sm:$0xff]   ;;  %v5967_v53 = vld [vmem:[#allocation5 + $0x2cc] ss:$48 sps:$4 sm:$0xff]  }
  0xe5   :  { %2163 = vmatprep.subr.bf16.mxu1 %v5874_v52  ;;  %v5964_v52 = vld [vmem:[#allocation5 + $0x5c4] ss:$48 sps:$4 sm:$0xff]  }
  0xe7   :  { %2191 = vmatpush1.bf16.msra.mxu0 %v5875_v56  ;;  %v5965_v56 = vld [vmem:[#allocation5 + $0x2c8] ss:$48 sps:$4 sm:$0xff]  }
  0xe8   :  { %2164 = vmatpush2.bf16.msra.mxu1 %v5872_v55  ;;  %2192 = vmatprep.subr.bf16.mxu0 %v5883_v58  ;;  %v5962_v55 = vld [vmem:[#allocation5 + $0x5c0] ss:$48 sps:$4 sm:$0xff]   ;;  %v5973_v58 = vld [vmem:[#allocation5 + $0x26c] ss:$48 sps:$4 sm:$0xff]  }
  0xe9   :  { %2165 = vmatprep.subr.bf16.mxu1 %v5880_v57  ;;  %v5970_v57 = vld [vmem:[#allocation5 + $0x564] ss:$48 sps:$4 sm:$0xff]  }
  0xeb   :  { %2193 = vmatpush1.bf16.msra.mxu0 %v5881_v60  ;;  %v5971_v60 = vld [vmem:[#allocation5 + $0x268] ss:$48 sps:$4 sm:$0xff]  }
  0xec   :  { %2166 = vmatpush2.bf16.msra.mxu1 %v5878_v59  ;;  %2194 = vmatprep.subr.bf16.mxu0 %v5889_v62  ;;  %v5968_v59 = vld [vmem:[#allocation5 + $0x560] ss:$48 sps:$4 sm:$0xff]   ;;  %v5979_v62 = vld [vmem:[#allocation5 + $0x20c] ss:$48 sps:$4 sm:$0xff]  }
  0xed   :  { %2167 = vmatprep.subr.bf16.mxu1 %v5886_v61  ;;  %v5976_v61 = vld [vmem:[#allocation5 + $0x504] ss:$48 sps:$4 sm:$0xff]  }
  0xef   :  { %2195 = vmatpush1.bf16.msra.mxu0 %v5887_v1  ;;  %v5977_v1 = vld [vmem:[#allocation5 + $0x208] ss:$48 sps:$4 sm:$0xff]  }
  0xf0   :  { %2168 = vmatpush2.bf16.msra.mxu1 %v5884_v63  ;;  %2196 = vmatprep.subr.bf16.mxu0 %v5895_v3  ;;  %v5974_v63 = vld [vmem:[#allocation5 + $0x500] ss:$48 sps:$4 sm:$0xff]   ;;  %v5985_v3 = vld [vmem:[#allocation5 + $0x1ac] ss:$48 sps:$4 sm:$0xff]  }
  0xf1   :  { %2169 = vmatprep.subr.bf16.mxu1 %v5892_v2  ;;  %v5982_v2 = vld [vmem:[#allocation5 + $0x4a4] ss:$48 sps:$4 sm:$0xff]  }
  0xf3   :  { %2197 = vmatpush1.bf16.msra.mxu0 %v5893_v5  ;;  %v5983_v5 = vld [vmem:[#allocation5 + $0x1a8] ss:$48 sps:$4 sm:$0xff]  }
  0xf4   :  { %2170 = vmatpush2.bf16.msra.mxu1 %v5890_v4  ;;  %2198 = vmatprep.subr.bf16.mxu0 %v5901_v7  ;;  %v5980_v4 = vld [vmem:[#allocation5 + $0x4a0] ss:$48 sps:$4 sm:$0xff]   ;;  %v5991_v7 = vld [vmem:[#allocation5 + $0x14c] ss:$48 sps:$4 sm:$0xff]  }
  0xf5   :  { %2171 = vmatprep.subr.bf16.mxu1 %v5898_v6  ;;  %v5988_v6 = vld [vmem:[#allocation5 + $0x444] ss:$48 sps:$4 sm:$0xff]  }
  0xf7   :  { %2199 = vmatpush1.bf16.msra.mxu0 %v5899_v9  ;;  %v5994_v9 = vld [vmem:[#allocation5 + $0x3e4] ss:$48 sps:$4 sm:$0xff]  }
  0xf8   :  { %2172 = vmatpush2.bf16.msra.mxu1 %v5896_v8  ;;  %2200 = vmatprep.subr.bf16.mxu0 %v5907_v11  ;;  %v5986_v8 = vld [vmem:[#allocation5 + $0x440] ss:$48 sps:$4 sm:$0xff]  }
  0xf9   :  { %2173 = vmatprep.subr.bf16.mxu1 %v5904_v10  ;;  %v5997_v10 = vld [vmem:[#allocation5 + $0xec] ss:$48 sps:$4 sm:$0xff]   ;;  %v5992_v11 = vld [vmem:[#allocation5 + $0x3e0] ss:$48 sps:$4 sm:$0xff]  }
  0xfb   :  { %2201 = vmatpush1.bf16.msra.mxu0 %v5905_v14  ;;  %v6000_v14 = vld [vmem:[#allocation5 + $0x384] ss:$48 sps:$4 sm:$0xff]  }
  0xfc   :  { %2174 = vmatpush2.bf16.msra.mxu1 %v5902_v13  ;;  %2202 = vmatprep.subr.bf16.mxu0 %v5913_v16  ;;  %v5995_v13 = vld [vmem:[#allocation5 + $0xe8] ss:$48 sps:$4 sm:$0xff]   ;;  %v6003_v16 = vld [vmem:[#allocation5 + $0x8c] ss:$48 sps:$4 sm:$0xff]  }
  0xfd   :  { %2175 = vmatprep.subr.bf16.mxu1 %v5910_v15  ;;  %v387_v15 = vlaneseq }
  0xff   :  { %2203 = vmatpush1.bf16.msra.mxu0 %v5911_v18  ;;  %v6001_v18 = vld [vmem:[#allocation5 + $0x88] ss:$48 sps:$4 sm:$0xff]  }
 0x100   :  { %2176 = vmatpush2.bf16.msra.mxu1 %v5908_v17  ;;  %2231 = vmatprep.subr.bf16.mxu0 %v5916_v19  ;;  %v5998_v17 = vld [vmem:[#allocation5 + $0x380] ss:$48 sps:$4 sm:$0xff]   ;;  %v6006_v19 = vld [vmem:[#allocation5 + $0x324] ss:$48 sps:$4 sm:$0xff]  }
 0x101   :  { %2274 = vmatprep.subr.bf16.mxu1 %v5919_v20  ;;  %v6658_v20 = vshrl.u32 %v387_v15, 7  ;;  %v6052_v15 = vld [vmem:[#allocation5 + $0x328] ss:$48 sps:$4 sm:$0xff]  }
 0x102   :  { %2221 = vmatmul.mubr.bf16.vlgmr.msra.gmra.mxu0 %v6633_v37 }
 0x103   :  { %2178 = vmatmul.mubr.bf16.vlgmr.msra.gmra.mxu1 %v6640_v12  ;;  %2232 = vmatpush1.bf16.msra.mxu0 %v5914_v21  ;;  %v6009_v21 = vld [vmem:[#allocation5 + $0x2c] ss:$48 sps:$4 sm:$0xff]  }
 0x104   :  { %2275 = vmatpush1.bf16.msra.mxu1 %v5917_v22  ;;  %2233 = vmatprep.subr.bf16.mxu0 %v5922_v23  ;;  %v6004_v22 = vld [vmem:[#allocation5 + $0x320] ss:$48 sps:$4 sm:$0xff]   ;;  %v6007_v23 = vld [vmem:[#allocation5 + $0x28] ss:$48 sps:$4 sm:$0xff]  }
 0x105   :  { %2276 = vmatprep.subr.bf16.mxu1 %v5925_v24  ;;  %2306 = vmatprep.mubr.bf16.mxu1 %v6582_v0  ;;  %v6660_v24 = vld [vmem:[#allocation7] sm:$0xff] }
 0x106   :  { %2263 = vmatprep.mubr.bf16.mxu0 %v6636_v54 }
 0x107   :  { %2234 = vmatpush1.bf16.msra.mxu0 %v5920_v25  ;;  %v6663_v25 = vsub.s32 0, %v6658_v20 }
 0x108   :  { %2277 = vmatpush1.bf16.msra.mxu1 %v5923_v26  ;;  %2235 = vmatprep.subr.bf16.mxu0 %v5928_v27  ;;  %v6012_v26 = vld [vmem:[#allocation5 + $0x5cc] ss:$48 sps:$4 sm:$0xff]  }
 0x109   :  { %2278 = vmatprep.subr.bf16.mxu1 %v5931_v28  ;;  %v6015_v27 = vld [vmem:[#allocation5 + $0x8cc] ss:$48 sps:$4 sm:$0xff]   ;;  %v6010_v28 = vld [vmem:[#allocation5 + $0x5c8] ss:$48 sps:$4 sm:$0xff]  }
 0x10b   :  { %2236 = vmatpush1.bf16.msra.mxu0 %v5926_v29  ;;  %v390_v29 = vrot.slane %v6660_v24, %v6663_v25 }
 0x10c   :  { %2279 = vmatpush1.bf16.msra.mxu1 %v5929_v30  ;;  %2237 = vmatprep.subr.bf16.mxu0 %v5934_v31  ;;  %v6013_v30 = vld [vmem:[#allocation5 + $0x8c8] ss:$48 sps:$4 sm:$0xff]   ;;  %v6018_v31 = vld [vmem:[#allocation5 + $0x56c] ss:$48 sps:$4 sm:$0xff]  }
 0x10d   :  { %2280 = vmatprep.subr.bf16.mxu1 %v5937_v32 }
 0x10f   :  { %2238 = vmatpush1.bf16.msra.mxu0 %v5932_v33  ;;  %v6021_v33 = vld [vmem:[#allocation5 + $0x86c] ss:$48 sps:$4 sm:$0xff]  }
 0x110   :  { %2281 = vmatpush1.bf16.msra.mxu1 %v5935_v34  ;;  %2239 = vmatprep.subr.bf16.mxu0 %v5940_v35  ;;  %v6016_v35 = vld [vmem:[#allocation5 + $0x568] ss:$48 sps:$4 sm:$0xff]  }
 0x111   :  { %2282 = vmatprep.subr.bf16.mxu1 %v5943_v36  ;;  %v6019_v36 = vld [vmem:[#allocation5 + $0x868] ss:$48 sps:$4 sm:$0xff]  }
 0x113   :  { %2240 = vmatpush1.bf16.msra.mxu0 %v5938_v38 }
 0x114   :  { %2283 = vmatpush1.bf16.msra.mxu1 %v5941_v39  ;;  %2241 = vmatprep.subr.bf16.mxu0 %v5946_v40  ;;  %v6024_v39 = vld [vmem:[#allocation5 + $0x50c] ss:$48 sps:$4 sm:$0xff]  }
 0x115   :  { %2284 = vmatprep.subr.bf16.mxu1 %v5949_v41  ;;  %v6027_v40 = vld [vmem:[#allocation5 + $0x80c] ss:$48 sps:$4 sm:$0xff]  }
 0x117   :  { %2242 = vmatpush1.bf16.msra.mxu0 %v5944_v42 }
 0x118   :  { %2285 = vmatpush1.bf16.msra.mxu1 %v5947_v43  ;;  %2243 = vmatprep.subr.bf16.mxu0 %v5952_v44  ;;  %v6022_v44 = vld [vmem:[#allocation5 + $0x508] ss:$48 sps:$4 sm:$0xff]  }
 0x119   :  { %2286 = vmatprep.subr.bf16.mxu1 %v5955_v45  ;;  %v6025_v45 = vld [vmem:[#allocation5 + $0x808] ss:$48 sps:$4 sm:$0xff]  }
 0x11b   :  { %2244 = vmatpush1.bf16.msra.mxu0 %v5950_v46 }
 0x11c   :  { %2287 = vmatpush1.bf16.msra.mxu1 %v5953_v47  ;;  %2245 = vmatprep.subr.bf16.mxu0 %v5958_v48  ;;  %v6030_v47 = vld [vmem:[#allocation5 + $0x4ac] ss:$48 sps:$4 sm:$0xff]  }
 0x11d   :  { %2288 = vmatprep.subr.bf16.mxu1 %v5961_v49  ;;  %v6033_v48 = vld [vmem:[#allocation5 + $0x7ac] ss:$48 sps:$4 sm:$0xff]  }
 0x11f   :  { %2246 = vmatpush1.bf16.msra.mxu0 %v5956_v50 }
 0x120   :  { %2289 = vmatpush1.bf16.msra.mxu1 %v5959_v51  ;;  %2247 = vmatprep.subr.bf16.mxu0 %v5964_v52  ;;  %v6028_v52 = vld [vmem:[#allocation5 + $0x4a8] ss:$48 sps:$4 sm:$0xff]  }
 0x121   :  { %2317 = vmatprep.subr.bf16.mxu1 %v5967_v53  ;;  %v6031_v53 = vld [vmem:[#allocation5 + $0x7a8] ss:$48 sps:$4 sm:$0xff]  }
 0x123   :  { %2307 = vmatmul.mubr.bf16.vlgmr.msra.gmra.mxu1 %v6633_v37  ;;  %2248 = vmatpush2.bf16.msra.mxu0 %v5962_v55  ;;  %v1964_v32 = vpop.f32.mrf.mxu1  ;;  %v6036_v55 = vld [vmem:[#allocation5 + $0x44c] ss:$48 sps:$4 sm:$0xff]  }
 0x124   :  { %2318 = vmatpush1.bf16.msra.mxu1 %v5965_v56  ;;  %2249 = vmatprep.subr.bf16.mxu0 %v5970_v57  ;;  %v6039_v56 = vld [vmem:[#allocation5 + $0x74c] ss:$48 sps:$4 sm:$0xff]  }
 0x125   :  { %2319 = vmatprep.subr.bf16.mxu1 %v5973_v58  ;;  %2349 = vmatprep.mubr.bf16.mxu1 %v6636_v54  ;;  %v5989_v54 = vld [vmem:[#allocation5 + $0x148] ss:$48 sps:$4 sm:$0xff]   ;;  %v1966_v41 = vpop.f32.mrf.mxu1 }
 0x127   :  { %2250 = vmatpush2.bf16.msra.mxu0 %v5968_v59  ;;  %v1968_v50 = vpop.f32.mrf.mxu1  ;;  %v6034_v59 = vld [vmem:[#allocation5 + $0x448] ss:$48 sps:$4 sm:$0xff]  }
 0x128   :  { %2320 = vmatpush1.bf16.msra.mxu1 %v5971_v60  ;;  %2251 = vmatprep.subr.bf16.mxu0 %v5976_v61  ;;  %v6037_v60 = vld [vmem:[#allocation5 + $0x748] ss:$48 sps:$4 sm:$0xff]   ;;  %v6042_v61 = vld [vmem:[#allocation5 + $0x3ec] ss:$48 sps:$4 sm:$0xff]  }
 0x129   :  { %2321 = vmatprep.subr.bf16.mxu1 %v5979_v62  ;;  %v6045_v62 = vld [vmem:[#allocation5 + $0x6ec] ss:$48 sps:$4 sm:$0xff]  }
 0x12b   :  { %2252 = vmatpush2.bf16.msra.mxu0 %v5974_v63  ;;  %v6672_v63 = vsub.s32 1, %v6658_v20 }
 0x12c   :  { %2322 = vmatpush1.bf16.msra.mxu1 %v5977_v1  ;;  %2253 = vmatprep.subr.bf16.mxu0 %v5982_v2  ;;  %v6040_v1 = vld [vmem:[#allocation5 + $0x3e8] ss:$48 sps:$4 sm:$0xff]  }
 0x12d   :  { %2323 = vmatprep.subr.bf16.mxu1 %v5985_v3  ;;  %v6043_v3 = vld [vmem:[#allocation5 + $0x6e8] ss:$48 sps:$4 sm:$0xff]  }
 0x12f   :  { %2254 = vmatpush2.bf16.msra.mxu0 %v5980_v4  ;;  %v394_v4 = vrot.slane %v6660_v24, %v6672_v63 }
 0x130   :  { %2324 = vmatpush1.bf16.msra.mxu1 %v5983_v5  ;;  %2255 = vmatprep.subr.bf16.mxu0 %v5988_v6  ;;  %v6048_v5 = vld [vmem:[#allocation5 + $0x38c] ss:$48 sps:$4 sm:$0xff]  }
 0x131   :  { %2325 = vmatprep.subr.bf16.mxu1 %v5991_v7  ;;  %v6051_v6 = vld [vmem:[#allocation5 + $0x68c] ss:$48 sps:$4 sm:$0xff]  }
 0x133   :  { %2256 = vmatpush2.bf16.msra.mxu0 %v5986_v8  ;;  %v6046_v8 = vld [vmem:[#allocation5 + $0x388] ss:$48 sps:$4 sm:$0xff]  }
 0x134   :  { %2326 = vmatpush1.bf16.msra.mxu1 %v5989_v54  ;;  %2257 = vmatprep.subr.bf16.mxu0 %v5994_v9  ;;  %v6049_v54 = vld [vmem:[#allocation5 + $0x688] ss:$48 sps:$4 sm:$0xff]  }
 0x135   :  { %2327 = vmatprep.subr.bf16.mxu1 %v5997_v10  ;;  %v1970_v10 = vpop.f32.mrf.mxu1 }
 0x137   :  { %2258 = vmatpush2.bf16.msra.mxu0 %v5992_v11  ;;  %v6054_v11 = vld [vmem:[#allocation5 + $0x32c] ss:$48 sps:$4 sm:$0xff]  }
 0x138   :  { %2328 = vmatpush1.bf16.msra.mxu1 %v5995_v13  ;;  %2259 = vmatprep.subr.bf16.mxu0 %v6000_v14  ;;  %v6057_v13 = vld [vmem:[#allocation5 + $0x62c] ss:$48 sps:$4 sm:$0xff]  }
 0x139   :  { %2329 = vmatprep.subr.bf16.mxu1 %v6003_v16  ;;  %v6055_v16 = vld [vmem:[#allocation5 + $0x628] ss:$48 sps:$4 sm:$0xff]  }
 0x13b   :  { %2260 = vmatpush2.bf16.msra.mxu0 %v5998_v17 }
 0x13c   :  { %2330 = vmatpush1.bf16.msra.mxu1 %v6001_v18  ;;  %2261 = vmatprep.subr.bf16.mxu0 %v6006_v19  ;;  %v6060_v18 = vld [vmem:[#allocation8 + $0xac] ss:$12 sps:$4 sm:$0xff]  }
 0x13d   :  { %2331 = vmatprep.subr.bf16.mxu1 %v6009_v21  ;;  %v6063_v19 = vld [vmem:[#allocation8 + $0x22c] ss:$12 sps:$4 sm:$0xff]  }
 0x13f   :  { %2262 = vmatpush2.bf16.msra.mxu0 %v6004_v22  ;;  %v6058_v22 = vld [vmem:[#allocation8 + $0xa8] ss:$12 sps:$4 sm:$0xff]  }
 0x140   :  { %2332 = vmatpush1.bf16.msra.mxu1 %v6007_v23  ;;  %2360 = vmatprep.subr.bf16.mxu0 %v6015_v27  ;;  %v401_v23 = vsub.s32 3, %v6658_v20  ;;  %v6066_v27 = vld [vmem:[#allocation8 + $0x94] ss:$12 sps:$4 sm:$0xff]  }
 0x141   :  { %2333 = vmatprep.subr.bf16.mxu1 %v6012_v26  ;;  %v6061_v26 = vld [vmem:[#allocation8 + $0x228] ss:$12 sps:$4 sm:$0xff]  }
 0x142   :  { %v1921_v34 = vpop.f32.mrf.mxu0  ;;  %2264 = vmatmul.mubr.bf16.vlgmr.msra.gmra.mxu0 %v6640_v12 }
 0x143   :  { %v1922_v38 = vadd.f32 %v1921_v34, %v390_v29  ;;  %2361 = vmatpush1.bf16.msra.mxu0 %v6013_v30  ;;  %2392 = vmatprep.mubr.bf16.mxu0 %v6582_v0  ;;  %v402_v30 = vrot.slane %v6660_v24, %v401_v23 }
 0x144   :  { %2334 = vmatpush2.bf16.msra.mxu1 %v6010_v28  ;;  %v1923_v42 = vpop.f32.mrf.mxu0  ;;  %2362 = vmatprep.subr.bf16.mxu0 %v6021_v33 }
 0x145   :  { %2335 = vmatprep.subr.bf16.mxu1 %v6018_v31  ;;  %v1965_v43 = vadd.f32 %v1964_v32, %v1922_v38  ;;  %v1924_v9 = vadd.f32 %v1923_v42, %v394_v4  ;;  %v6064_v31 = vld [vmem:[#allocation8 + $0x90] ss:$12 sps:$4 sm:$0xff]   ;;  %v6069_v32 = vld [vmem:[#allocation8 + $0x214] ss:$12 sps:$4 sm:$0xff]  }
 0x146   :  { %v1925_v46 = vpop.f32.mrf.mxu0  ;;  %v6075_v42 = vld [vmem:[#allocation8 + $0x1fc] ss:$12 sps:$4 sm:$0xff]  }
 0x147   :  { %v1926_v49 = vadd.f32 %v1925_v46, %v390_v29  ;;  %2363 = vmatpush1.bf16.msra.mxu0 %v6019_v36  ;;  %v2403_v57 = vmax.f32 %v1965_v43, 0.0  ;;  %v1967_v17 = vadd.f32 %v1966_v41, %v1924_v9  ;;  %v6072_v36 = vld [vmem:[#allocation8 + $0x7c] ss:$12 sps:$4 sm:$0xff]   ;;  %v6070_v41 = vld [vmem:[#allocation8 + $0x78] ss:$12 sps:$4 sm:$0xff]  }
 0x148   :  { %2336 = vmatpush2.bf16.msra.mxu1 %v6016_v35  ;;  %2364 = vmatprep.subr.bf16.mxu0 %v6027_v40  ;;  %v1927_v2 = vpop.f32.mrf.mxu0  ;;  %v6067_v35 = vld [vmem:[#allocation8 + $0x210] ss:$12 sps:$4 sm:$0xff]   ;;  %v6103_v9 = vld [vmem:[#allocation8 + $0x180] ss:$12 sps:$4 sm:$0xff]  }
 0x149   :  { %2337 = vmatprep.subr.bf16.mxu1 %v6024_v39  ;;  %v1969_v51 = vadd.f32 %v1968_v50, %v1926_v49  ;;  %v1928_v7 = vadd.f32 %v1927_v2, %v394_v4  ;;  %v2404_v28 = vmax.f32 %v1967_v17, 0.0  ;;  %v6078_v46 = vld [vmem:[#allocation8 + $0x64] ss:$12 sps:$4 sm:$0xff]   ;;  %v6076_v49 = vld [vmem:[#allocation8 + $0x60] ss:$12 sps:$4 sm:$0xff]  }
 0x14a   :  { %v6091_v2 = vld [vmem:[#allocation8 + $0x1b0] ss:$12 sps:$4 sm:$0xff]   ;;  %v6117_v17 = vld [vmem:[#allocation8 + $0x2d4] ss:$12 sps:$4 sm:$0xff]  }
 0x14b   :  { %v2415_v58 = vmax.f32 %v1969_v51, 0.0  ;;  %2365 = vmatpush1.bf16.msra.mxu0 %v6025_v45  ;;  %v1971_v14 = vadd.f32 %v1970_v10, %v1928_v7  ;;  %v6079_v51 = vld [vmem:[#allocation8 + $0x1e0] ss:$12 sps:$4 sm:$0xff]   ;;  %v6099_v4 = vld [vmem:[#allocation8 + $0x19c] ss:$12 sps:$4 sm:$0xff]  }
 0x14c   :  { %2338 = vmatpush2.bf16.msra.mxu1 %v6022_v44  ;;  %2366 = vmatprep.subr.bf16.mxu0 %v6033_v48  ;;  %v6102_v7 = vld [vmem:[#allocation8 + $0x4] ss:$12 sps:$4 sm:$0xff]   ;;  %v6108_v10 = vld [vmem:[#allocation8 + $0x16c] ss:$12 sps:$4 sm:$0xff]  }
 0x14d   :  { %2339 = vmatprep.subr.bf16.mxu1 %v6030_v47  ;;  %v6669_v0 = vpack.c.bf16 %v2415_v58, %v2403_v57  ;;  %v2416_v21 = vmax.f32 %v1971_v14, 0.0  ;;  %v6081_v47 = vld [vmem:[#allocation8 + $0x1e4] ss:$12 sps:$4 sm:$0xff]   ;;  %v6109_v14 = vld [vmem:[#allocation8 + $0x2e8] ss:$12 sps:$4 sm:$0xff]  }
 0x14f   :  { %2367 = vmatpush1.bf16.msra.mxu0 %v6031_v53  ;;  %v6677_v29 = vpack.c.bf16 %v2416_v21, %v2404_v28  ;;  %v6084_v53 = vld [vmem:[#allocation8 + $0x4c] ss:$12 sps:$4 sm:$0xff]  }
 0x150   :  { %2340 = vmatpush2.bf16.msra.mxu1 %v6028_v52  ;;  %2368 = vmatprep.subr.bf16.mxu0 %v6039_v56  ;;  %v6118_v21 = vld [vmem:[#allocation8 + $0x138] ss:$12 sps:$4 sm:$0xff]   ;;  %v6124_v28 = vld [vmem:[#allocation8 + $0x120] ss:$12 sps:$4 sm:$0xff]  }
 0x151   :  { %2341 = vmatprep.subr.bf16.mxu1 %v6036_v55  ;;  %v6087_v55 = vld [vmem:[#allocation8 + $0x1cc] ss:$12 sps:$4 sm:$0xff]  }
 0x153   :  { %2369 = vmatpush1.bf16.msra.mxu0 %v6037_v60  ;;  %v6085_v60 = vld [vmem:[#allocation8 + $0x1c8] ss:$12 sps:$4 sm:$0xff]  }
 0x154   :  { %2342 = vmatpush2.bf16.msra.mxu1 %v6034_v59  ;;  %2370 = vmatprep.subr.bf16.mxu0 %v6045_v62  ;;  %v6082_v59 = vld [vmem:[#allocation8 + $0x48] ss:$12 sps:$4 sm:$0xff]  }
 0x155   :  { %2343 = vmatprep.subr.bf16.mxu1 %v6042_v61  ;;  %v6090_v61 = vld [vmem:[#allocation8 + $0x34] ss:$12 sps:$4 sm:$0xff]  }
 0x156   :  { %v6093_v62 = vld [vmem:[#allocation8 + $0x1b4] ss:$12 sps:$4 sm:$0xff]  }
 0x157   :  { %2371 = vmatpush1.bf16.msra.mxu0 %v6043_v3  ;;  %v6096_v3 = vld [vmem:[#allocation8 + $0x1c] ss:$12 sps:$4 sm:$0xff]  }
 0x158   :  { %2344 = vmatpush2.bf16.msra.mxu1 %v6040_v1  ;;  %2372 = vmatprep.subr.bf16.mxu0 %v6051_v6  ;;  %v6088_v1 = vld [vmem:[#allocation8 + $0x30] ss:$12 sps:$4 sm:$0xff]   ;;  %v6097_v6 = vld [vmem:[#allocation8 + $0x198] ss:$12 sps:$4 sm:$0xff]  }
 0x159   :  { %2345 = vmatprep.subr.bf16.mxu1 %v6048_v5  ;;  %v6094_v5 = vld [vmem:[#allocation8 + $0x18] ss:$12 sps:$4 sm:$0xff]  }
 0x15b   :  { %2373 = vmatpush1.bf16.msra.mxu0 %v6049_v54  ;;  %v6100_v54 = vld [vmem:[#allocation8] ss:$12 sps:$4 sm:$0xff]  }
 0x15c   :  { %2346 = vmatpush2.bf16.msra.mxu1 %v6046_v8  ;;  %2374 = vmatprep.subr.bf16.mxu0 %v6057_v13  ;;  %v6105_v8 = vld [vmem:[#allocation8 + $0x184] ss:$12 sps:$4 sm:$0xff]   ;;  %v6106_v13 = vld [vmem:[#allocation8 + $0x168] ss:$12 sps:$4 sm:$0xff]  }
 0x15d   :  { %2347 = vmatprep.subr.bf16.mxu1 %v6054_v11  ;;  %v6111_v11 = vld [vmem:[#allocation8 + $0x2ec] ss:$12 sps:$4 sm:$0xff]  }
 0x15f   :  { %2375 = vmatpush1.bf16.msra.mxu0 %v6055_v16  ;;  %v6112_v16 = vld [vmem:[#allocation8 + $0x150] ss:$12 sps:$4 sm:$0xff]  }
 0x160   :  { %2348 = vmatpush2.bf16.msra.mxu1 %v6052_v15  ;;  %4376 = vmatprep.subr.bf16.mxu0 %v6060_v18  ;;  %v6114_v15 = vld [vmem:[#allocation8 + $0x154] ss:$12 sps:$4 sm:$0xff]   ;;  %v6115_v18 = vld [vmem:[#allocation8 + $0x2d0] ss:$12 sps:$4 sm:$0xff]  }
 0x161   :  { %4419 = vmatprep.subr.bf16.mxu1 %v6063_v19  ;;  %v6120_v19 = vld [vmem:[#allocation8 + $0x13c] ss:$12 sps:$4 sm:$0xff]  }
 0x162   :  { %v6684_v34 = vpop.f32.mrf.mxu0  ;;  %2393 = vmatmul.mubr.bf16.vlgmr.msra.gmra.mxu0 %v6633_v37 }
 0x163   :  { %v6682_v33 = vpop.f32.mrf.mxu1  ;;  %2350 = vmatmul.mubr.bf16.vlgmr.msra.gmra.mxu1 %v6640_v12  ;;  %4377 = vmatpush1.bf16.msra.mxu0 %v6058_v22  ;;  %v6073_v12 = vld [vmem:[#allocation8 + $0x1f8] ss:$12 sps:$4 sm:$0xff]   ;;  %v6123_v22 = vld [vmem:[#allocation8 + $0x2bc] ss:$12 sps:$4 sm:$0xff]  }
 0x164   :  { %4408 = vmatprep.mubr.bf16.mxu0 %v6677_v29  ;;  %4420 = vmatpush1.bf16.msra.mxu1 %v6061_v26  ;;  %v2052_v39 = vpop.f32.mrf.mxu0  ;;  %v6121_v26 = vld [vmem:[#allocation8 + $0x2b8] ss:$12 sps:$4 sm:$0xff]  }
 0x165   :  { %v2009_v38 = vpop.f32.mrf.mxu1  ;;  %4378 = vmatprep.subr.bf16.mxu0 %v6066_v27  ;;  %4421 = vmatprep.subr.bf16.mxu1 %v6069_v32  ;;  %v6126_v27 = vld [vmem:[#allocation8 + $0x124] ss:$12 sps:$4 sm:$0xff]   ;;  %v6132_v32 = vld [vmem:[#allocation8 + $0x10c] ss:$12 sps:$4 sm:$0xff]  }
 0x166   :  { %v2010_v40 = vadd.f32 %v2009_v38, %v402_v30  ;;  %v6691_v44 = vpop.f32.mrf.mxu0  ;;  %v6135_v38 = vld [vmem:[#allocation8 + $0x28c] ss:$12 sps:$4 sm:$0xff]  }
 0x167   :  { %v6689_v43 = vpop.f32.mrf.mxu1  ;;  %4379 = vmatpush1.bf16.msra.mxu0 %v6064_v31  ;;  %v6127_v31 = vld [vmem:[#allocation8 + $0x2a0] ss:$12 sps:$4 sm:$0xff]  }
 0x168   :  { %v2053_v37 = vadd.f32 %v2052_v39, %v2010_v40  ;;  %4422 = vmatpush1.bf16.msra.mxu1 %v6067_v35  ;;  %4380 = vmatprep.subr.bf16.mxu0 %v6072_v36  ;;  %v2056_v50 = vpop.f32.mrf.mxu0  ;;  %v6697_v35 = vsub.s32 2, %v6658_v20  ;;  %v6130_v36 = vld [vmem:[#allocation8 + $0x108] ss:$12 sps:$4 sm:$0xff]  }
 0x169   :  { %v2013_v45 = vpop.f32.mrf.mxu1  ;;  %4423 = vmatprep.subr.bf16.mxu1 %v6075_v42  ;;  %v6133_v39 = vld [vmem:[#allocation8 + $0x288] ss:$12 sps:$4 sm:$0xff]  }
 0x16a   :  { %v2014_v48 = vadd.f32 %v2013_v45, %v402_v30  ;;  %v2406_v56 = vmax.f32 %v2053_v37, 0.0  ;;  %v6129_v30 = vld [vmem:[#allocation8 + $0x2a4] ss:$12 sps:$4 sm:$0xff]   ;;  %v6138_v40 = vld [vmem:[#allocation8 + $0xf4] ss:$12 sps:$4 sm:$0xff]   ;;  %v398_v42 = vrot.slane %v6660_v24, %v6697_v35 }
 0x16b   :  { %4381 = vmatpush1.bf16.msra.mxu0 %v6070_v41  ;;  %v6141_v41 = vld [vmem:[#allocation8 + $0x274] ss:$12 sps:$4 sm:$0xff]   ;;  %v6139_v37 = vld [vmem:[#allocation8 + $0x270] ss:$12 sps:$4 sm:$0xff]  }
 0x16c   :  { %v2057_v52 = vadd.f32 %v2056_v50, %v2014_v48  ;;  %4424 = vmatpush1.bf16.msra.mxu1 %v6073_v12  ;;  %4382 = vmatprep.subr.bf16.mxu0 %v6078_v46  ;;  %v6136_v12 = vld [vmem:[#allocation8 + $0xf0] ss:$12 sps:$4 sm:$0xff]   ;;  %v2012_v46 = vadd.f32 %v6689_v43, %v398_v42  ;;  %v2008_v48 = vadd.f32 %v6682_v33, %v398_v42  ;;  %v6145_v50 = vld [vmem:[#allocation8 + $0x258] ss:$12 sps:$4 sm:$0xff]   ;;  %v6151_v43 = vld [vmem:[#allocation8 + $0x240] ss:$12 sps:$4 sm:$0xff]  }
 0x16d   :  { %4425 = vmatprep.subr.bf16.mxu1 %v6081_v47  ;;  %v6144_v45 = vld [vmem:[#allocation8 + $0xdc] ss:$12 sps:$4 sm:$0xff]   ;;  %v409_v33 = vsub.s32 5, %v6658_v20  ;;  %v6189_v42 = vld [vmem:[#allocation8 + $0x4b4] ss:$12 sps:$4 sm:$0xff]  }
 0x16e   :  { %v2418_v57 = vmax.f32 %v2057_v52, 0.0  ;;  %v6147_v47 = vld [vmem:[#allocation8 + $0x25c] ss:$12 sps:$4 sm:$0xff]   ;;  %v2055_v52 = vadd.f32 %v6691_v44, %v2012_v46 }
 0x16f   :  { %4383 = vmatpush1.bf16.msra.mxu0 %v6076_v49  ;;  %v6142_v49 = vld [vmem:[#allocation8 + $0xd8] ss:$12 sps:$4 sm:$0xff]   ;;  %v6157_v44 = vld [vmem:[#allocation8 + $0x528] ss:$12 sps:$4 sm:$0xff]  }
 0x170   :  { %v6693_v58 = vpack.c.bf16 %v2418_v57, %v2406_v56  ;;  %4426 = vmatpush1.bf16.msra.mxu1 %v6079_v51  ;;  %4384 = vmatprep.subr.bf16.mxu0 %v6084_v53  ;;  %v6150_v51 = vld [vmem:[#allocation8 + $0xc4] ss:$12 sps:$4 sm:$0xff]   ;;  %v2051_v56 = vadd.f32 %v6684_v34, %v2008_v48  ;;  %v6156_v57 = vld [vmem:[#allocation8 + $0x3ac] ss:$12 sps:$4 sm:$0xff]   ;;  %v6195_v46 = vld [vmem:[#allocation8 + $0x49c] ss:$12 sps:$4 sm:$0xff]  }
 0x171   :  { %4427 = vmatprep.subr.bf16.mxu1 %v6087_v55  ;;  %v6153_v53 = vld [vmem:[#allocation8 + $0x244] ss:$12 sps:$4 sm:$0xff]   ;;  %v6148_v55 = vld [vmem:[#allocation8 + $0xc0] ss:$12 sps:$4 sm:$0xff]  }
 0x172   :  { %4451 = vmatprep.mubr.bf16.mxu1 %v6693_v58  ;;  %v6193_v48 = vld [vmem:[#allocation8 + $0x498] ss:$12 sps:$4 sm:$0xff]  }
 0x173   :  { %4385 = vmatpush1.bf16.msra.mxu0 %v6082_v59  ;;  %v6159_v59 = vld [vmem:[#allocation8 + $0x52c] ss:$12 sps:$4 sm:$0xff]  }
 0x174   :  { %4428 = vmatpush1.bf16.msra.mxu1 %v6085_v60  ;;  %4386 = vmatprep.subr.bf16.mxu0 %v6090_v61  ;;  %v2417_v60 = vmax.f32 %v2055_v52, 0.0  ;;  %v6154_v61 = vld [vmem:[#allocation8 + $0x3a8] ss:$12 sps:$4 sm:$0xff]   ;;  %v6199_v52 = vld [vmem:[#allocation8 + $0x480] ss:$12 sps:$4 sm:$0xff]  }
 0x175   :  { %4429 = vmatprep.subr.bf16.mxu1 %v6093_v62 }
 0x177   :  { %4387 = vmatpush1.bf16.msra.mxu0 %v6088_v1  ;;  %v2405_v1 = vmax.f32 %v2051_v56, 0.0  ;;  %v417_v56 = vsub.s32 7, %v6658_v20 }
 0x178   :  { %4430 = vmatpush1.bf16.msra.mxu1 %v6091_v2  ;;  %4388 = vmatprep.subr.bf16.mxu0 %v6096_v3  ;;  %v6162_v2 = vld [vmem:[#allocation8 + $0x394] ss:$12 sps:$4 sm:$0xff]   ;;  %v410_v3 = vrot.slane %v6660_v24, %v409_v33 }
 0x179   :  { %4431 = vmatprep.subr.bf16.mxu1 %v6099_v4  ;;  %v6708_v34 = vpack.c.bf16 %v2417_v60, %v2405_v1  ;;  %v6160_v4 = vld [vmem:[#allocation8 + $0x390] ss:$12 sps:$4 sm:$0xff]   ;;  %v6442_v60 = vld [vmem:[#allocation7] sm:$0xff] }
 0x17a   :  { %v418_v33 = vrot.slane %v6442_v60, %v417_v56  ;;  %v6238_v56 = vld [vmem:[#allocation8 + $0x3d8] ss:$12 sps:$4 sm:$0xff]  }
 0x17b   :  { %4389 = vmatpush1.bf16.msra.mxu0 %v6094_v5  ;;  %v6165_v5 = vld [vmem:[#allocation8 + $0x514] ss:$12 sps:$4 sm:$0xff]  }
 0x17c   :  { %4432 = vmatpush1.bf16.msra.mxu1 %v6097_v6  ;;  %4390 = vmatprep.subr.bf16.mxu0 %v6102_v7 }
 0x17d   :  { %4433 = vmatprep.subr.bf16.mxu1 %v6105_v8  ;;  %v6163_v8 = vld [vmem:[#allocation8 + $0x510] ss:$12 sps:$4 sm:$0xff]  }
 0x17f   :  { %4391 = vmatpush1.bf16.msra.mxu0 %v6100_v54 }
 0x180   :  { %4434 = vmatpush1.bf16.msra.mxu1 %v6103_v9  ;;  %4392 = vmatprep.subr.bf16.mxu0 %v6108_v10  ;;  %v6168_v9 = vld [vmem:[#allocation8 + $0x37c] ss:$12 sps:$4 sm:$0xff]  }
 0x181   :  { %4435 = vmatprep.subr.bf16.mxu1 %v6111_v11  ;;  %v6171_v11 = vld [vmem:[#allocation8 + $0x4fc] ss:$12 sps:$4 sm:$0xff]  }
 0x183   :  { %4393 = vmatpush2.bf16.msra.mxu0 %v6106_v13  ;;  %v6706_v62 = vpop.f32.mrf.mxu1 }
 0x184   :  { %4436 = vmatpush2.bf16.msra.mxu1 %v6109_v14  ;;  %4394 = vmatprep.subr.bf16.mxu0 %v6114_v15  ;;  %v6166_v14 = vld [vmem:[#allocation8 + $0x378] ss:$12 sps:$4 sm:$0xff]  }
 0x185   :  { %4437 = vmatprep.subr.bf16.mxu1 %v6117_v17  ;;  %v2138_v6 = vpop.f32.mrf.mxu1  ;;  %v6169_v15 = vld [vmem:[#allocation8 + $0x4f8] ss:$12 sps:$4 sm:$0xff]  }
 0x186   :  { %v6174_v17 = vld [vmem:[#allocation8 + $0x364] ss:$12 sps:$4 sm:$0xff]  }
 0x187   :  { %4395 = vmatpush2.bf16.msra.mxu0 %v6112_v16  ;;  %v6715_v13 = vpop.f32.mrf.mxu1 }
 0x188   :  { %4438 = vmatpush2.bf16.msra.mxu1 %v6115_v18  ;;  %4396 = vmatprep.subr.bf16.mxu0 %v6120_v19 }
 0x189   :  { %4439 = vmatprep.subr.bf16.mxu1 %v6123_v22  ;;  %v2142_v22 = vpop.f32.mrf.mxu1 }
 0x18b   :  { %4397 = vmatpush2.bf16.msra.mxu0 %v6118_v21  ;;  %v6177_v21 = vld [vmem:[#allocation8 + $0x4e4] ss:$12 sps:$4 sm:$0xff]  }
 0x18c   :  { %4440 = vmatpush2.bf16.msra.mxu1 %v6121_v26  ;;  %4398 = vmatprep.subr.bf16.mxu0 %v6126_v27  ;;  %v6172_v26 = vld [vmem:[#allocation8 + $0x360] ss:$12 sps:$4 sm:$0xff]  }
 0x18d   :  { %4441 = vmatprep.subr.bf16.mxu1 %v6129_v30  ;;  %v6180_v30 = vld [vmem:[#allocation8 + $0x34c] ss:$12 sps:$4 sm:$0xff]  }
 0x18f   :  { %4399 = vmatpush2.bf16.msra.mxu0 %v6124_v28  ;;  %v6175_v28 = vld [vmem:[#allocation8 + $0x4e0] ss:$12 sps:$4 sm:$0xff]  }
 0x190   :  { %4442 = vmatpush2.bf16.msra.mxu1 %v6127_v31  ;;  %4400 = vmatprep.subr.bf16.mxu0 %v6132_v32 }
 0x191   :  { %4443 = vmatprep.subr.bf16.mxu1 %v6135_v38  ;;  %v6183_v38 = vld [vmem:[#allocation8 + $0x4cc] ss:$12 sps:$4 sm:$0xff]  }
 0x193   :  { %4401 = vmatpush2.bf16.msra.mxu0 %v6130_v36  ;;  %v6178_v36 = vld [vmem:[#allocation8 + $0x348] ss:$12 sps:$4 sm:$0xff]  }
 0x194   :  { %4444 = vmatpush2.bf16.msra.mxu1 %v6133_v39  ;;  %4402 = vmatprep.subr.bf16.mxu0 %v6138_v40  ;;  %v6181_v39 = vld [vmem:[#allocation8 + $0x4c8] ss:$12 sps:$4 sm:$0xff]  }
 0x195   :  { %4445 = vmatprep.subr.bf16.mxu1 %v6141_v41  ;;  %v6186_v41 = vld [vmem:[#allocation8 + $0x334] ss:$12 sps:$4 sm:$0xff]  }
 0x197   :  { %4403 = vmatpush2.bf16.msra.mxu0 %v6136_v12  ;;  %v6184_v12 = vld [vmem:[#allocation8 + $0x330] ss:$12 sps:$4 sm:$0xff]  }
 0x198   :  { %4446 = vmatpush2.bf16.msra.mxu1 %v6139_v37  ;;  %4404 = vmatprep.subr.bf16.mxu0 %v6144_v45  ;;  %v6187_v37 = vld [vmem:[#allocation8 + $0x4b0] ss:$12 sps:$4 sm:$0xff]  }
 0x199   :  { %4447 = vmatprep.subr.bf16.mxu1 %v6147_v47  ;;  %v6192_v45 = vld [vmem:[#allocation8 + $0x31c] ss:$12 sps:$4 sm:$0xff]   ;;  %v6190_v47 = vld [vmem:[#allocation8 + $0x318] ss:$12 sps:$4 sm:$0xff]  }
 0x19b   :  { %4405 = vmatpush2.bf16.msra.mxu0 %v6142_v49  ;;  %v6198_v49 = vld [vmem:[#allocation8 + $0x304] ss:$12 sps:$4 sm:$0xff]  }
 0x19c   :  { %4448 = vmatpush2.bf16.msra.mxu1 %v6145_v50  ;;  %4406 = vmatprep.subr.bf16.mxu0 %v6150_v51  ;;  %v6201_v50 = vld [vmem:[#allocation8 + $0x484] ss:$12 sps:$4 sm:$0xff]   ;;  %v6196_v51 = vld [vmem:[#allocation8 + $0x300] ss:$12 sps:$4 sm:$0xff]  }
 0x19d   :  { %4449 = vmatprep.subr.bf16.mxu1 %v6153_v53  ;;  %v6204_v53 = vld [vmem:[#allocation8 + $0x46c] ss:$12 sps:$4 sm:$0xff]  }
 0x19f   :  { %4407 = vmatpush2.bf16.msra.mxu0 %v6148_v55  ;;  %v6207_v55 = vld [vmem:[#allocation8 + $0x5ec] ss:$12 sps:$4 sm:$0xff]  }
 0x1a0   :  { %4450 = vmatpush2.bf16.msra.mxu1 %v6151_v43  ;;  %4462 = vmatprep.subr.bf16.mxu0 %v6156_v57  ;;  %v6202_v43 = vld [vmem:[#allocation8 + $0x468] ss:$12 sps:$4 sm:$0xff]  }
 0x1a1   :  { %4505 = vmatprep.subr.bf16.mxu1 %v6159_v59  ;;  %v6205_v57 = vld [vmem:[#allocation8 + $0x5e8] ss:$12 sps:$4 sm:$0xff]  }
 0x1a2   :  { %v6711_v7 = vpop.f32.mrf.mxu0  ;;  %4409 = vmatmul.mubr.bf16.vlgmr.msra.gmra.mxu0 %v6669_v0  ;;  %v6210_v59 = vld [vmem:[#allocation8 + $0x454] ss:$12 sps:$4 sm:$0xff]  }
 0x1a3   :  { %4452 = vmatmul.mubr.bf16.vlgmr.msra.gmra.mxu1 %v6708_v34  ;;  %4463 = vmatpush1.bf16.msra.mxu0 %v6154_v61  ;;  %v6213_v61 = vld [vmem:[#allocation8 + $0x5d4] ss:$12 sps:$4 sm:$0xff]  }
 0x1a4   :  { %4506 = vmatpush1.bf16.msra.mxu1 %v6157_v44  ;;  %v2095_v54 = vpop.f32.mrf.mxu0  ;;  %4464 = vmatprep.subr.bf16.mxu0 %v6162_v2  ;;  %v6208_v2 = vld [vmem:[#allocation8 + $0x450] ss:$12 sps:$4 sm:$0xff]  }
 0x1a5   :  { %v2096_v10 = vadd.f32 %v2095_v54, %v410_v3  ;;  %4507 = vmatprep.subr.bf16.mxu1 %v6165_v5  ;;  %v6211_v5 = vld [vmem:[#allocation8 + $0x5d0] ss:$12 sps:$4 sm:$0xff]  }
 0x1a6   :  { %v6717_v24 = vpop.f32.mrf.mxu0  ;;  %v6219_v54 = vld [vmem:[#allocation8 + $0x5bc] ss:$12 sps:$4 sm:$0xff]  }
 0x1a7   :  { %4465 = vmatpush1.bf16.msra.mxu0 %v6160_v4  ;;  %v2139_v18 = vadd.f32 %v2138_v6, %v2096_v10  ;;  %v6216_v6 = vld [vmem:[#allocation8 + $0x43c] ss:$12 sps:$4 sm:$0xff]  }
 0x1a8   :  { %4508 = vmatpush1.bf16.msra.mxu1 %v6163_v8  ;;  %v2099_v16 = vpop.f32.mrf.mxu0  ;;  %4466 = vmatprep.subr.bf16.mxu0 %v6168_v9 }
 0x1a9   :  { %v2100_v19 = vadd.f32 %v2099_v16, %v410_v3  ;;  %4509 = vmatprep.subr.bf16.mxu1 %v6171_v11  ;;  %v2408_v31 = vmax.f32 %v2139_v18, 0.0  ;;  %v6214_v11 = vld [vmem:[#allocation8 + $0x438] ss:$12 sps:$4 sm:$0xff]  }
 0x1aa   :  { %v6222_v16 = vld [vmem:[#allocation8 + $0x424] ss:$12 sps:$4 sm:$0xff]  }
 0x1ab   :  { %v2143_v27 = vadd.f32 %v2142_v22, %v2100_v19  ;;  %4467 = vmatpush1.bf16.msra.mxu0 %v6166_v14  ;;  %v6217_v14 = vld [vmem:[#allocation8 + $0x5b8] ss:$12 sps:$4 sm:$0xff]   ;;  %v413_v22 = vsub.s32 6, %v6658_v20 }
 0x1ac   :  { %4510 = vmatpush1.bf16.msra.mxu1 %v6169_v15  ;;  %4468 = vmatprep.subr.bf16.mxu0 %v6174_v17  ;;  %v6225_v19 = vld [vmem:[#allocation8 + $0x5a4] ss:$12 sps:$4 sm:$0xff]  }
 0x1ad   :  { %v2420_v32 = vmax.f32 %v2143_v27, 0.0  ;;  %4511 = vmatprep.subr.bf16.mxu1 %v6177_v21  ;;  %v405_v21 = vsub.s32 4, %v6658_v20 }
 0x1af   :  { %4469 = vmatpush1.bf16.msra.mxu0 %v6172_v26  ;;  %v6719_v40 = vpack.c.bf16 %v2420_v32, %v2408_v31  ;;  %v6228_v31 = vld [vmem:[#allocation8 + $0x40c] ss:$12 sps:$4 sm:$0xff]  }
 0x1b0   :  { %4512 = vmatpush1.bf16.msra.mxu1 %v6175_v28  ;;  %4470 = vmatprep.subr.bf16.mxu0 %v6180_v30  ;;  %v6220_v28 = vld [vmem:[#allocation8 + $0x420] ss:$12 sps:$4 sm:$0xff]  }
 0x1b1   :  { %4494 = vmatprep.mubr.bf16.mxu0 %v6719_v40  ;;  %4513 = vmatprep.subr.bf16.mxu1 %v6183_v38  ;;  %v6223_v30 = vld [vmem:[#allocation8 + $0x5a0] ss:$12 sps:$4 sm:$0xff]   ;;  %v6226_v38 = vld [vmem:[#allocation8 + $0x408] ss:$12 sps:$4 sm:$0xff]  }
 0x1b3   :  { %4471 = vmatpush1.bf16.msra.mxu0 %v6178_v36 }
 0x1b4   :  { %4514 = vmatpush1.bf16.msra.mxu1 %v6181_v39  ;;  %4472 = vmatprep.subr.bf16.mxu0 %v6186_v41  ;;  %v6231_v39 = vld [vmem:[#allocation8 + $0x58c] ss:$12 sps:$4 sm:$0xff]   ;;  %v6229_v41 = vld [vmem:[#allocation8 + $0x588] ss:$12 sps:$4 sm:$0xff]  }
 0x1b5   :  { %4515 = vmatprep.subr.bf16.mxu1 %v6189_v42 }
 0x1b7   :  { %4473 = vmatpush1.bf16.msra.mxu0 %v6184_v12  ;;  %v6234_v12 = vld [vmem:[#allocation8 + $0x3f4] ss:$12 sps:$4 sm:$0xff]  }
 0x1b8   :  { %4516 = vmatpush1.bf16.msra.mxu1 %v6187_v37  ;;  %4474 = vmatprep.subr.bf16.mxu0 %v6192_v45  ;;  %v6237_v37 = vld [vmem:[#allocation8 + $0x574] ss:$12 sps:$4 sm:$0xff]   ;;  %v406_v45 = vrot.slane %v6442_v60, %v405_v21  ;;  %v6282_v21 = vld [vmem:[#allocation8 + $0x7e4] ss:$12 sps:$4 sm:$0xff]  }
 0x1b9   :  { %4517 = vmatprep.subr.bf16.mxu1 %v6195_v46  ;;  %v414_v46 = vrot.slane %v6442_v60, %v413_v22  ;;  %v6249_v60 = vld [vmem:[#allocation8 + $0x544] ss:$12 sps:$4 sm:$0xff]   ;;  %v6259_v22 = vld [vmem:[#allocation8 + $0x660] ss:$12 sps:$4 sm:$0xff]  }
 0x1bb   :  { %4475 = vmatpush1.bf16.msra.mxu0 %v6190_v47  ;;  %v6232_v47 = vld [vmem:[#allocation8 + $0x3f0] ss:$12 sps:$4 sm:$0xff]  }
 0x1bc   :  { %4518 = vmatpush1.bf16.msra.mxu1 %v6193_v48  ;;  %4476 = vmatprep.subr.bf16.mxu0 %v6198_v49  ;;  %v2098_v48 = vadd.f32 %v6717_v24, %v406_v45  ;;  %v6235_v49 = vld [vmem:[#allocation8 + $0x570] ss:$12 sps:$4 sm:$0xff]  }
 0x1bd   :  { %4519 = vmatprep.subr.bf16.mxu1 %v6201_v50  ;;  %v6240_v50 = vld [vmem:[#allocation8 + $0x3dc] ss:$12 sps:$4 sm:$0xff]  }
 0x1bf   :  { %4477 = vmatpush1.bf16.msra.mxu0 %v6196_v51 }
 0x1c0   :  { %4520 = vmatpush1.bf16.msra.mxu1 %v6199_v52  ;;  %4478 = vmatprep.subr.bf16.mxu0 %v6204_v53  ;;  %v6243_v52 = vld [vmem:[#allocation8 + $0x55c] ss:$12 sps:$4 sm:$0xff]   ;;  %v2094_v53 = vadd.f32 %v6711_v7, %v406_v45  ;;  %v6285_v45 = vld [vmem:[#allocation8 + $0x604] ss:$12 sps:$4 sm:$0xff]  }
 0x1c1   :  { %4521 = vmatprep.subr.bf16.mxu1 %v6207_v55 }
 0x1c2   :  { %v6725_v1 = vpop.f32.mrf.mxu0 }
 0x1c3   :  { %v6723_v44 = vpop.f32.mrf.mxu1  ;;  %4479 = vmatpush2.bf16.msra.mxu0 %v6202_v43  ;;  %v2141_v43 = vadd.f32 %v6715_v13, %v2098_v48  ;;  %v6264_v13 = vld [vmem:[#allocation8 + $0x82c] ss:$12 sps:$4 sm:$0xff]  }
 0x1c4   :  { %4522 = vmatpush2.bf16.msra.mxu1 %v6205_v57  ;;  %v2224_v4 = vpop.f32.mrf.mxu0  ;;  %4480 = vmatprep.subr.bf16.mxu0 %v6210_v59  ;;  %v2180_v55 = vadd.f32 %v6723_v44, %v414_v46  ;;  %v6241_v57 = vld [vmem:[#allocation8 + $0x558] ss:$12 sps:$4 sm:$0xff]   ;;  %v6247_v44 = vld [vmem:[#allocation8 + $0x540] ss:$12 sps:$4 sm:$0xff]  }
 0x1c5   :  { %v2181_v3 = vpop.f32.mrf.mxu1  ;;  %4523 = vmatprep.subr.bf16.mxu1 %v6213_v61  ;;  %v6246_v59 = vld [vmem:[#allocation8 + $0x3c4] ss:$12 sps:$4 sm:$0xff]   ;;  %v2419_v7 = vmax.f32 %v2141_v43, 0.0  ;;  %v6283_v48 = vld [vmem:[#allocation8 + $0x600] ss:$12 sps:$4 sm:$0xff]  }
 0x1c6   :  { %v2182_v8 = vadd.f32 %v2181_v3, %v418_v33  ;;  %v2226_v10 = vpop.f32.mrf.mxu0  ;;  %v2223_v61 = vadd.f32 %v6725_v1, %v2180_v55  ;;  %v6252_v3 = vld [vmem:[#allocation8 + $0x6ac] ss:$12 sps:$4 sm:$0xff]   ;;  %v6262_v1 = vld [vmem:[#allocation8 + $0x828] ss:$12 sps:$4 sm:$0xff]   ;;  %v6746_v55 = vld [vmem:[#allocation7 + $0x8] sm:$0xf] }
 0x1c7   :  { %v2183_v9 = vpop.f32.mrf.mxu1  ;;  %4481 = vmatpush2.bf16.msra.mxu0 %v6208_v2  ;;  %v6244_v2 = vld [vmem:[#allocation8 + $0x3c0] ss:$12 sps:$4 sm:$0xff]   ;;  %v6310_v43 = vld [vmem:[#allocation8 + $0x8e8] ss:$12 sps:$4 sm:$0xff]  }
 0x1c8   :  { %4524 = vmatpush2.bf16.msra.mxu1 %v6211_v5  ;;  %4482 = vmatprep.subr.bf16.mxu0 %v6216_v6  ;;  %v2225_v17 = vadd.f32 %v2224_v4, %v2182_v8  ;;  %v2228_v26 = vpop.f32.mrf.mxu0  ;;  %v2184_v51 = vadd.f32 %v2183_v9, %v414_v46  ;;  %v2409_v6 = vmax.f32 %v2223_v61, 0.0  ;;  %v6250_v8 = vld [vmem:[#allocation8 + $0x6a8] ss:$12 sps:$4 sm:$0xff]   ;;  %v6298_v46 = vld [vmem:[#allocation8 + $0x798] ss:$12 sps:$4 sm:$0xff]  }
 0x1c9   :  { %v2185_v15 = vpop.f32.mrf.mxu1  ;;  %4525 = vmatprep.subr.bf16.mxu1 %v6219_v54 }
 0x1ca   :  { %v2186_v18 = vadd.f32 %v2185_v15, %v418_v33  ;;  %v2410_v32 = vmax.f32 %v2225_v17, 0.0  ;;  %v2227_v24 = vadd.f32 %v2226_v10, %v2184_v51  ;;  %v2137_v33 = vadd.f32 %v6706_v62, %v2094_v53  ;;  %v6255_v62 = vld [vmem:[#allocation8 + $0x694] ss:$12 sps:$4 sm:$0xff]   ;;  %v6268_v15 = vld [vmem:[#allocation8 + $0x810] ss:$12 sps:$4 sm:$0xff]  }
 0x1cb   :  { %4483 = vmatpush2.bf16.msra.mxu0 %v6214_v11  ;;  %v6270_v10 = vld [vmem:[#allocation8 + $0x814] ss:$12 sps:$4 sm:$0xff]   ;;  %v6253_v11 = vld [vmem:[#allocation8 + $0x690] ss:$12 sps:$4 sm:$0xff]   ;;  %v6256_v17 = vld [vmem:[#allocation8 + $0x678] ss:$12 sps:$4 sm:$0xff]  }
 0x1cc   :  { %v2229_v27 = vadd.f32 %v2228_v26, %v2186_v18  ;;  %4526 = vmatpush2.bf16.msra.mxu1 %v6217_v14  ;;  %4484 = vmatprep.subr.bf16.mxu0 %v6222_v16  ;;  %v2421_v4 = vmax.f32 %v2227_v24, 0.0  ;;  %v2407_v5 = vmax.f32 %v2137_v33, 0.0  ;;  %v6258_v14 = vld [vmem:[#allocation8 + $0x67c] ss:$12 sps:$4 sm:$0xff]   ;;  %v6261_v18 = vld [vmem:[#allocation8 + $0x664] ss:$12 sps:$4 sm:$0xff]  }
 0x1cd   :  { %4527 = vmatprep.subr.bf16.mxu1 %v6225_v19  ;;  %v6276_v16 = vld [vmem:[#allocation8 + $0x7fc] ss:$12 sps:$4 sm:$0xff]   ;;  %v6274_v19 = vld [vmem:[#allocation8 + $0x7f8] ss:$12 sps:$4 sm:$0xff]  }
 0x1ce   :  { %v2422_v36 = vmax.f32 %v2229_v27, 0.0  ;;  %v6738_v54 = vpack.c.bf16 %v2419_v7, %v2407_v5  ;;  %v6740_v9 = vpack.c.bf16 %v2421_v4, %v2409_v6  ;;  %v6267_v26 = vld [vmem:[#allocation8 + $0x64c] ss:$12 sps:$4 sm:$0xff]   ;;  %v6289_v53 = vld [vmem:[#allocation8 + $0x768] ss:$12 sps:$4 sm:$0xff]  }
 0x1cf   :  { %4485 = vmatpush2.bf16.msra.mxu0 %v6220_v28  ;;  %v6280_v27 = vld [vmem:[#allocation8 + $0x7e0] ss:$12 sps:$4 sm:$0xff]   ;;  %v6295_v33 = vld [vmem:[#allocation8 + $0x750] ss:$12 sps:$4 sm:$0xff]   ;;  %v6301_v5 = vld [vmem:[#allocation8 + $0x738] ss:$12 sps:$4 sm:$0xff]  }
 0x1d0   :  { %v6729_v42 = vpack.c.bf16 %v2422_v36, %v2410_v32  ;;  %4528 = vmatpush2.bf16.msra.mxu1 %v6223_v30  ;;  %4486 = vmatprep.subr.bf16.mxu0 %v6228_v31  ;;  %v6288_v28 = vld [vmem:[#allocation8 + $0x7cc] ss:$12 sps:$4 sm:$0xff]   ;;  %v6265_v30 = vld [vmem:[#allocation8 + $0x648] ss:$12 sps:$4 sm:$0xff]   ;;  %v6316_v7 = vld [vmem:[#allocation8 + $0x8d0] ss:$12 sps:$4 sm:$0xff]  }
 0x1d1   :  { %4529 = vmatprep.subr.bf16.mxu1 %v6231_v39  ;;  %v6273_v31 = vld [vmem:[#allocation8 + $0x634] ss:$12 sps:$4 sm:$0xff]   ;;  %v6279_v39 = vld [vmem:[#allocation8 + $0x61c] ss:$12 sps:$4 sm:$0xff]   ;;  %v6312_v51 = vld [vmem:[#allocation8 + $0x8ec] ss:$12 sps:$4 sm:$0xff]  }
 0x1d2   :  { %4537 = vmatprep.mubr.bf16.mxu1 %v6729_v42  ;;  %v6286_v32 = vld [vmem:[#allocation8 + $0x7c8] ss:$12 sps:$4 sm:$0xff]  }
 0x1d3   :  { %4487 = vmatpush2.bf16.msra.mxu0 %v6226_v38  ;;  %v6294_v36 = vld [vmem:[#allocation8 + $0x7b4] ss:$12 sps:$4 sm:$0xff]   ;;  %v6271_v38 = vld [vmem:[#allocation8 + $0x630] ss:$12 sps:$4 sm:$0xff]  }
 0x1d4   :  { %4530 = vmatpush2.bf16.msra.mxu1 %v6229_v41  ;;  %4488 = vmatprep.subr.bf16.mxu0 %v6234_v12  ;;  %v6292_v41 = vld [vmem:[#allocation8 + $0x7b0] ss:$12 sps:$4 sm:$0xff]  }
 0x1d5   :  { %4531 = vmatprep.subr.bf16.mxu1 %v6237_v37  ;;  %v6300_v12 = vld [vmem:[#allocation8 + $0x79c] ss:$12 sps:$4 sm:$0xff]   ;;  %v6277_v37 = vld [vmem:[#allocation8 + $0x618] ss:$12 sps:$4 sm:$0xff]  }
 0x1d7   :  { %4489 = vmatpush2.bf16.msra.mxu0 %v6232_v47  ;;  %v6306_v47 = vld [vmem:[#allocation8 + $0x784] ss:$12 sps:$4 sm:$0xff]  }
 0x1d8   :  { %4532 = vmatpush2.bf16.msra.mxu1 %v6235_v49  ;;  %4490 = vmatprep.subr.bf16.mxu0 %v6240_v50  ;;  %v6291_v49 = vld [vmem:[#allocation8 + $0x76c] ss:$12 sps:$4 sm:$0xff]  }
 0x1d9   :  { %4533 = vmatprep.subr.bf16.mxu1 %v6243_v52  ;;  %v6304_v50 = vld [vmem:[#allocation8 + $0x780] ss:$12 sps:$4 sm:$0xff]  }
 0x1db   :  { %4491 = vmatpush2.bf16.msra.mxu0 %v6238_v56  ;;  %v6297_v56 = vld [vmem:[#allocation8 + $0x754] ss:$12 sps:$4 sm:$0xff]  }
 0x1dc   :  { %4534 = vmatpush2.bf16.msra.mxu1 %v6241_v57  ;;  %4492 = vmatprep.subr.bf16.mxu0 %v6246_v59  ;;  %v426_v57 = vrot.slane %v6746_v55, %v6672_v63  ;;  %v6318_v59 = vld [vmem:[#allocation8 + $0x8d4] ss:$12 sps:$4 sm:$0xff]  }
 0x1dd   :  { %4535 = vmatprep.subr.bf16.mxu1 %v6249_v60 }
 0x1df   :  { %4493 = vmatpush2.bf16.msra.mxu0 %v6244_v2  ;;  %v6303_v2 = vld [vmem:[#allocation8 + $0x73c] ss:$12 sps:$4 sm:$0xff]  }
 0x1e0   :  { %4536 = vmatpush2.bf16.msra.mxu1 %v6247_v44  ;;  %4548 = vmatprep.subr.bf16.mxu0 %v6252_v3  ;;  %v6324_v3 = vld [vmem:[#allocation8 + $0x8bc] ss:$12 sps:$4 sm:$0xff]  }
 0x1e1   :  { %4591 = vmatprep.subr.bf16.mxu1 %v6264_v13 }
 0x1e2   :  { %4495 = vmatmul.mubr.bf16.vlgmr.msra.gmra.mxu0 %v6738_v54 }
 0x1e3   :  { %4538 = vmatmul.mubr.bf16.vlgmr.msra.gmra.mxu1 %v6740_v9  ;;  %4549 = vmatpush1.bf16.msra.mxu0 %v6250_v8  ;;  %v6744_v52 = vpop.f32.mrf.mxu1  ;;  %v6309_v8 = vld [vmem:[#allocation8 + $0x724] ss:$12 sps:$4 sm:$0xff]  }
 0x1e4   :  { %4550 = vmatprep.subr.bf16.mxu0 %v6255_v62  ;;  %4592 = vmatpush1.bf16.msra.mxu1 %v6262_v1  ;;  %v6322_v62 = vld [vmem:[#allocation8 + $0x8b8] ss:$12 sps:$4 sm:$0xff]  }
 0x1e5   :  { %4593 = vmatprep.subr.bf16.mxu1 %v6270_v10  ;;  %v2310_v24 = vpop.f32.mrf.mxu1 }
 0x1e7   :  { %4551 = vmatpush1.bf16.msra.mxu0 %v6253_v11  ;;  %v2312_v4 = vpop.f32.mrf.mxu1  ;;  %v6330_v11 = vld [vmem:[#allocation8 + $0x8a4] ss:$12 sps:$4 sm:$0xff]  }
 0x1e8   :  { %4552 = vmatprep.subr.bf16.mxu0 %v6258_v14  ;;  %4594 = vmatpush1.bf16.msra.mxu1 %v6268_v15 }
 0x1e9   :  { %4595 = vmatprep.subr.bf16.mxu1 %v6276_v16  ;;  %v2314_v14 = vpop.f32.mrf.mxu1  ;;  %v6307_v16 = vld [vmem:[#allocation8 + $0x720] ss:$12 sps:$4 sm:$0xff]  }
 0x1eb   :  { %4553 = vmatpush1.bf16.msra.mxu0 %v6256_v17  ;;  %v6315_v17 = vld [vmem:[#allocation8 + $0x70c] ss:$12 sps:$4 sm:$0xff]  }
 0x1ec   :  { %4554 = vmatprep.subr.bf16.mxu0 %v6261_v18  ;;  %4596 = vmatpush1.bf16.msra.mxu1 %v6274_v19  ;;  %v6328_v18 = vld [vmem:[#allocation8 + $0x8a0] ss:$12 sps:$4 sm:$0xff]  }
 0x1ed   :  { %4597 = vmatprep.subr.bf16.mxu1 %v6282_v21 }
 0x1ef   :  { %4555 = vmatpush1.bf16.msra.mxu0 %v6259_v22  ;;  %v6336_v22 = vld [vmem:[#allocation8 + $0x88c] ss:$12 sps:$4 sm:$0xff]  }
 0x1f0   :  { %4556 = vmatprep.subr.bf16.mxu0 %v6267_v26  ;;  %4598 = vmatpush1.bf16.msra.mxu1 %v6280_v27  ;;  %v6313_v27 = vld [vmem:[#allocation8 + $0x708] ss:$12 sps:$4 sm:$0xff]  }
 0x1f1   :  { %4599 = vmatprep.subr.bf16.mxu1 %v6288_v28  ;;  %v6321_v28 = vld [vmem:[#allocation8 + $0x6f4] ss:$12 sps:$4 sm:$0xff]  }
 0x1f3   :  { %4557 = vmatpush1.bf16.msra.mxu0 %v6265_v30  ;;  %v6334_v30 = vld [vmem:[#allocation8 + $0x888] ss:$12 sps:$4 sm:$0xff]  }
 0x1f4   :  { %4558 = vmatprep.subr.bf16.mxu0 %v6273_v31  ;;  %4600 = vmatpush1.bf16.msra.mxu1 %v6286_v32  ;;  %v6341_v31 = vld [vmem:[#allocation8 + $0x874] ss:$12 sps:$4 sm:$0xff]   ;;  %v422_v32 = vrot.slane %v6746_v55, %v6663_v25 }
 0x1f5   :  { %4601 = vmatprep.subr.bf16.mxu1 %v6294_v36  ;;  %v6319_v36 = vld [vmem:[#allocation8 + $0x6f0] ss:$12 sps:$4 sm:$0xff]  }
 0x1f7   :  { %4559 = vmatpush1.bf16.msra.mxu0 %v6271_v38 }
 0x1f8   :  { %4560 = vmatprep.subr.bf16.mxu0 %v6279_v39  ;;  %4602 = vmatpush1.bf16.msra.mxu1 %v6292_v41  ;;  %v6327_v39 = vld [vmem:[#allocation8 + $0x6dc] ss:$12 sps:$4 sm:$0xff]  }
 0x1f9   :  { %4603 = vmatprep.subr.bf16.mxu1 %v6300_v12  ;;  %v6339_v41 = vld [vmem:[#allocation8 + $0x870] ss:$12 sps:$4 sm:$0xff]  }
 0x1fa   :  { %v6346_v12 = vld [vmem:[#allocation8 + $0x85c] ss:$12 sps:$4 sm:$0xff]  }
 0x1fb   :  { %4561 = vmatpush1.bf16.msra.mxu0 %v6277_v37 }
 0x1fc   :  { %4562 = vmatprep.subr.bf16.mxu0 %v6285_v45  ;;  %4604 = vmatpush1.bf16.msra.mxu1 %v6298_v46  ;;  %v6325_v45 = vld [vmem:[#allocation8 + $0x6d8] ss:$12 sps:$4 sm:$0xff]  }
 0x1fd   :  { %4605 = vmatprep.subr.bf16.mxu1 %v6306_v47  ;;  %v6333_v47 = vld [vmem:[#allocation8 + $0x6c4] ss:$12 sps:$4 sm:$0xff]  }
 0x1ff   :  { %4563 = vmatpush1.bf16.msra.mxu0 %v6283_v48  ;;  %v6344_v48 = vld [vmem:[#allocation8 + $0x858] ss:$12 sps:$4 sm:$0xff]  }
 0x200   :  { %4564 = vmatprep.subr.bf16.mxu0 %v6291_v49  ;;  %4606 = vmatpush1.bf16.msra.mxu1 %v6304_v50  ;;  %v6351_v49 = vld [vmem:[#allocation8 + $0x844] ss:$12 sps:$4 sm:$0xff]  }
 0x201   :  { %4607 = vmatprep.subr.bf16.mxu1 %v6312_v51  ;;  %v6331_v51 = vld [vmem:[#allocation8 + $0x6c0] ss:$12 sps:$4 sm:$0xff]  }
 0x202   :  { %v2265_v60 = vpop.f32.mrf.mxu0 }
 0x203   :  { %4565 = vmatpush2.bf16.msra.mxu0 %v6289_v53  ;;  %v2266_v37 = vadd.f32 %v2265_v60, %v422_v32 }
 0x204   :  { %v2267_v61 = vpop.f32.mrf.mxu0  ;;  %4566 = vmatprep.subr.bf16.mxu0 %v6297_v56  ;;  %4608 = vmatpush2.bf16.msra.mxu1 %v6310_v43  ;;  %v6337_v56 = vld [vmem:[#allocation8 + $0x170] ss:$12 sps:$4 sm:$0xff]   ;;  %v6349_v43 = vld [vmem:[#allocation8 + $0x840] ss:$12 sps:$4 sm:$0xff]  }
 0x205   :  { %v2268_v44 = vadd.f32 %v2267_v61, %v426_v57  ;;  %4609 = vmatprep.subr.bf16.mxu1 %v6318_v59  ;;  %v2309_v50 = vadd.f32 %v6744_v52, %v2266_v37  ;;  %v434_v52 = vrot.slane %v6746_v55, %v401_v23  ;;  %v430_v61 = vrot.slane %v6746_v55, %v6697_v35  ;;  %v6363_v37 = vld [vmem:[#allocation8 + $0xe0] ss:$12 sps:$4 sm:$0xff]  }
 0x206   :  { %v2269_v13 = vpop.f32.mrf.mxu0 }
 0x207   :  { %4567 = vmatpush2.bf16.msra.mxu0 %v6295_v33  ;;  %v2311_v1 = vadd.f32 %v2310_v24, %v2268_v44  ;;  %v2270_v38 = vadd.f32 %v2269_v13, %v422_v32  ;;  %v2411_v59 = vmax.f32 %v2309_v50, 0.0  ;;  %v6338_v24 = vld [vmem:[#allocation8 + $0xb0] ss:$12 sps:$4 sm:$0xff]   ;;  %v6342_v33 = vld [vmem:[#allocation8 + $0x158] ss:$12 sps:$4 sm:$0xff]  }
 0x208   :  { %v2271_v6 = vpop.f32.mrf.mxu0  ;;  %4568 = vmatprep.subr.bf16.mxu0 %v6303_v2  ;;  %4610 = vmatpush2.bf16.msra.mxu1 %v6316_v7  ;;  %v6343_v44 = vld [vmem:[#allocation8 + $0x98] ss:$12 sps:$4 sm:$0xff]   ;;  %v6347_v13 = vld [vmem:[#allocation8 + $0x140] ss:$12 sps:$4 sm:$0xff]   ;;  %v6369_v50 = vld [vmem:[#allocation8 + $0x8] ss:$12 sps:$4 sm:$0xff]  }
 0x209   :  { %v2272_v10 = vadd.f32 %v2271_v6, %v426_v57  ;;  %4611 = vmatprep.subr.bf16.mxu1 %v6324_v3  ;;  %v2412_v19 = vmax.f32 %v2311_v1, 0.0  ;;  %v2313_v46 = vadd.f32 %v2312_v4, %v2270_v38  ;;  %v6354_v57 = vld [vmem:[#allocation8 + $0x2f0] ss:$12 sps:$4 sm:$0xff]   ;;  %v6352_v1 = vld [vmem:[#allocation8 + $0x128] ss:$12 sps:$4 sm:$0xff]  }
 0x20a   :  { %v6359_v38 = vld [vmem:[#allocation8 + $0xf8] ss:$12 sps:$4 sm:$0xff]  }
 0x20b   :  { %v2315_v15 = vadd.f32 %v2314_v14, %v2272_v10  ;;  %4569 = vmatpush2.bf16.msra.mxu0 %v6301_v5  ;;  %v2423_v53 = vmax.f32 %v2313_v46, 0.0  ;;  %v6365_v46 = vld [vmem:[#allocation8 + $0x20] ss:$12 sps:$4 sm:$0xff]  }
 0x20c   :  { %4570 = vmatprep.subr.bf16.mxu0 %v6309_v8  ;;  %4612 = vmatpush2.bf16.msra.mxu1 %v6322_v62  ;;  %v6348_v62 = vld [vmem:[#allocation8 + $0x80] ss:$12 sps:$4 sm:$0xff]  }
 0x20d   :  { %v2424_v21 = vmax.f32 %v2315_v15, 0.0  ;;  %4613 = vmatprep.subr.bf16.mxu1 %v6330_v11  ;;  %v6756_v60 = vpack.c.bf16 %v2423_v53, %v2411_v59  ;;  %v6371_v53 = vld [vmem:[#allocation8 + $0x1d0] ss:$12 sps:$4 sm:$0xff]   ;;  %v6375_v59 = vld [vmem:[#allocation8 + $0x1b8] ss:$12 sps:$4 sm:$0xff]  }
 0x20f   :  { %4571 = vmatpush2.bf16.msra.mxu0 %v6307_v16  ;;  %v6750_v26 = vpack.c.bf16 %v2424_v21, %v2412_v19  ;;  %v6355_v19 = vld [vmem:[#allocation8 + $0x110] ss:$12 sps:$4 sm:$0xff]  }
 0x210   :  { %4572 = vmatprep.subr.bf16.mxu0 %v6315_v17  ;;  %4614 = vmatpush2.bf16.msra.mxu1 %v6328_v18  ;;  %v6353_v17 = vld [vmem:[#allocation8 + $0x68] ss:$12 sps:$4 sm:$0xff]  }
 0x211   :  { %4580 = vmatprep.mubr.bf16.mxu0 %v6750_v26  ;;  %4615 = vmatprep.subr.bf16.mxu1 %v6336_v22 }
 0x213   :  { %4573 = vmatpush2.bf16.msra.mxu0 %v6313_v27 }
 0x214   :  { %4574 = vmatprep.subr.bf16.mxu0 %v6321_v28  ;;  %4616 = vmatpush2.bf16.msra.mxu1 %v6334_v30  ;;  %v6356_v30 = vld [vmem:[#allocation8 + $0x230] ss:$12 sps:$4 sm:$0xff]  }
 0x215   :  { %4617 = vmatprep.subr.bf16.mxu1 %v6341_v31  ;;  %v6357_v31 = vld [vmem:[#allocation8 + $0x50] ss:$12 sps:$4 sm:$0xff]  }
 0x217   :  { %4575 = vmatpush2.bf16.msra.mxu0 %v6319_v36  ;;  %v6358_v36 = vld [vmem:[#allocation8 + $0x2d8] ss:$12 sps:$4 sm:$0xff]  }
 0x218   :  { %4576 = vmatprep.subr.bf16.mxu0 %v6327_v39  ;;  %4618 = vmatpush2.bf16.msra.mxu1 %v6339_v41  ;;  %v6360_v39 = vld [vmem:[#allocation8 + $0x218] ss:$12 sps:$4 sm:$0xff]  }
 0x219   :  { %4619 = vmatprep.subr.bf16.mxu1 %v6346_v12  ;;  %v6361_v41 = vld [vmem:[#allocation8 + $0x38] ss:$12 sps:$4 sm:$0xff]   ;;  %v6362_v12 = vld [vmem:[#allocation8 + $0x2c0] ss:$12 sps:$4 sm:$0xff]  }
 0x21b   :  { %4577 = vmatpush2.bf16.msra.mxu0 %v6325_v45  ;;  %v6364_v45 = vld [vmem:[#allocation8 + $0x200] ss:$12 sps:$4 sm:$0xff]  }
 0x21c   :  { %4578 = vmatprep.subr.bf16.mxu0 %v6333_v47  ;;  %4620 = vmatpush2.bf16.msra.mxu1 %v6344_v48  ;;  %v6366_v47 = vld [vmem:[#allocation8 + $0x2a8] ss:$12 sps:$4 sm:$0xff]  }
 0x21d   :  { %4621 = vmatprep.subr.bf16.mxu1 %v6351_v49  ;;  %v6367_v48 = vld [vmem:[#allocation8 + $0xc8] ss:$12 sps:$4 sm:$0xff]  }
 0x21e   :  { %v6368_v49 = vld [vmem:[#allocation8 + $0x1e8] ss:$12 sps:$4 sm:$0xff]  }
 0x21f   :  { %4579 = vmatpush2.bf16.msra.mxu0 %v6331_v51  ;;  %v6370_v51 = vld [vmem:[#allocation8 + $0x290] ss:$12 sps:$4 sm:$0xff]  }
 0x220   :  { %5481 = vmatprep.subr.bf16.mxu0 %v6337_v56  ;;  %4622 = vmatpush2.bf16.msra.mxu1 %v6349_v43  ;;  %v6373_v56 = vld [vmem:[#allocation8 + $0x3b0] ss:$12 sps:$4 sm:$0xff]   ;;  %v6374_v43 = vld [vmem:[#allocation8 + $0x278] ss:$12 sps:$4 sm:$0xff]  }
 0x221   :  { %5503 = vmatprep.subr.bf16.mxu1 %v6354_v57  ;;  %v6376_v57 = vld [vmem:[#allocation8 + $0x458] ss:$12 sps:$4 sm:$0xff]  }
 0x222   :  { %v2394_v7 = vpop.f32.mrf.mxu0  ;;  %4581 = vmatmul.mubr.bf16.vlgmr.msra.gmra.mxu0 %v6756_v60 }
 0x223   :  { %v2351_v2 = vpop.f32.mrf.mxu1  ;;  %5482 = vmatpush3.bf16.msra.mxu0 %v6338_v24  ;;  %4666 = vmatprep.mubr.bf16.mxu0 %v6677_v29  ;;  %v6377_v24 = vld [vmem:[#allocation8 + $0x398] ss:$12 sps:$4 sm:$0xff]  }
 0x224   :  { %v2396_v4 = vpop.f32.mrf.mxu0  ;;  %5483 = vmatprep.subr.bf16.mxu0 %v6342_v33  ;;  %v2352_v20 = vadd.f32 %v2351_v2, %v430_v61  ;;  %v6378_v33 = vld [vmem:[#allocation8 + $0x260] ss:$12 sps:$4 sm:$0xff]  }
 0x225   :  { %v2353_v3 = vpop.f32.mrf.mxu1  ;;  %v6381_v2 = vld [vmem:[#allocation8 + $0x380] ss:$12 sps:$4 sm:$0xff]  }
 0x226   :  { %v2354_v5 = vadd.f32 %v2353_v3, %v434_v52  ;;  %v2398_v23 = vpop.f32.mrf.mxu0  ;;  %v2395_v15 = vadd.f32 %v2394_v7, %v2352_v20  ;;  %v6382_v7 = vld [vmem:[#allocation8 + $0x248] ss:$12 sps:$4 sm:$0xff]   ;;  %v6390_v20 = vld [vmem:[#allocation8 + $0x5d8] ss:$12 sps:$4 sm:$0xff]  }
 0x227   :  { %v2355_v6 = vpop.f32.mrf.mxu1  ;;  %5484 = vmatpush3.bf16.msra.mxu0 %v6343_v44  ;;  %v6384_v44 = vld [vmem:[#allocation8 + $0x428] ss:$12 sps:$4 sm:$0xff]  }
 0x228   :  { %v2356_v8 = vadd.f32 %v2355_v6, %v430_v61  ;;  %5485 = vmatprep.subr.bf16.mxu0 %v6347_v13  ;;  %v2397_v10 = vadd.f32 %v2396_v4, %v2354_v5  ;;  %v2400_v29 = vpop.f32.mrf.mxu0  ;;  %v2413_v27 = vmax.f32 %v2395_v15, 0.0  ;;  %v6379_v61 = vld [vmem:[#allocation8 + $0x1a0] ss:$12 sps:$4 sm:$0xff]   ;;  %v6385_v3 = vld [vmem:[#allocation8 + $0x368] ss:$12 sps:$4 sm:$0xff]  }
 0x229   :  { %v2357_v55 = vpop.f32.mrf.mxu1  ;;  %v6386_v4 = vld [vmem:[#allocation8 + $0x5f0] ss:$12 sps:$4 sm:$0xff]   ;;  %v6391_v6 = vld [vmem:[#allocation8 + $0x3f8] ss:$12 sps:$4 sm:$0xff]  }
 0x22a   :  { %v2399_v11 = vadd.f32 %v2398_v23, %v2356_v8  ;;  %v2358_v14 = vadd.f32 %v2357_v55, %v434_v52  ;;  %v2414_v21 = vmax.f32 %v2397_v10, 0.0  ;;  %v6380_v52 = vld [vmem:[#allocation8 + $0x440] ss:$12 sps:$4 sm:$0xff]   ;;  %v6388_v13 = vld [vmem:[#allocation8 + $0x530] ss:$12 sps:$4 sm:$0xff]  }
 0x22b   :  { %5486 = vmatpush3.bf16.msra.mxu0 %v6348_v62  ;;  %v6389_v5 = vld [vmem:[#allocation8 + $0x350] ss:$12 sps:$4 sm:$0xff]   ;;  %v6392_v23 = vld [vmem:[#allocation8 + $0x518] ss:$12 sps:$4 sm:$0xff]   ;;  %v6394_v62 = vld [vmem:[#allocation8 + $0x5c0] ss:$12 sps:$4 sm:$0xff]  }
 0x22c   :  { %v2401_v16 = vadd.f32 %v2400_v29, %v2358_v14  ;;  %v2425_v18 = vmax.f32 %v2399_v11, 0.0  ;;  %5487 = vmatprep.subr.bf16.mxu0 %v6352_v1  ;;  %v6393_v8 = vld [vmem:[#allocation8 + $0x338] ss:$12 sps:$4 sm:$0xff]   ;;  %v6395_v55 = vld [vmem:[#allocation8 + $0x3e0] ss:$12 sps:$4 sm:$0xff]  }
 0x22d   :  { %v6396_v1 = vld [vmem:[#allocation8 + $0x500] ss:$12 sps:$4 sm:$0xff]   ;;  %v6398_v11 = vld [vmem:[#allocation8 + $0x5a8] ss:$12 sps:$4 sm:$0xff]   ;;  %v6402_v15 = vld [vmem:[#allocation8 + $0x590] ss:$12 sps:$4 sm:$0xff]  }
 0x22e   :  { %v2426_v22 = vmax.f32 %v2401_v16, 0.0  ;;  %v6767_v32 = vpack.c.bf16 %v2425_v18, %v2413_v27  ;;  %v6397_v10 = vld [vmem:[#allocation8 + $0x320] ss:$12 sps:$4 sm:$0xff]   ;;  %v6399_v14 = vld [vmem:[#allocation8 + $0x3c8] ss:$12 sps:$4 sm:$0xff]  }
 0x22f   :  { %5488 = vmatpush3.bf16.msra.mxu0 %v6353_v17  ;;  %v6404_v29 = vld [vmem:[#allocation8 + $0x770] ss:$12 sps:$4 sm:$0xff]   ;;  %v6406_v18 = vld [vmem:[#allocation8 + $0x578] ss:$12 sps:$4 sm:$0xff]   ;;  %v6410_v27 = vld [vmem:[#allocation8 + $0x560] ss:$12 sps:$4 sm:$0xff]  }
 0x230   :  { %v6765_v28 = vpack.c.bf16 %v2426_v22, %v2414_v21  ;;  %5489 = vmatprep.subr.bf16.mxu0 %v6355_v19  ;;  %v6403_v16 = vld [vmem:[#allocation8 + $0x4d0] ss:$12 sps:$4 sm:$0xff]   ;;  %v6408_v19 = vld [vmem:[#allocation8 + $0x758] ss:$12 sps:$4 sm:$0xff]  }
 0x231   :  { %v6405_v17 = vld [vmem:[#allocation8 + $0x6b0] ss:$12 sps:$4 sm:$0xff]   ;;  %v6407_v21 = vld [vmem:[#allocation8 + $0x4b8] ss:$12 sps:$4 sm:$0xff]  }
 0x232   :  { %4623 = vmatprep.mubr.bf16.mxu1 %v6765_v28  ;;  %v6409_v22 = vld [vmem:[#allocation8 + $0x698] ss:$12 sps:$4 sm:$0xff]  }
 0x233   :  { %4624 = vmatmul.mubr.bf16.vlgmr.msra.gmra.mxu1 %v6767_v32  ;;  %5490 = vmatpush3.bf16.msra.mxu0 %v6357_v31  ;;  %v6411_v31 = vld [vmem:[#allocation8 + $0x4a0] ss:$12 sps:$4 sm:$0xff]  }
 0x234   :  { %5504 = vmatpush3.bf16.msra.mxu1 %v6356_v30  ;;  %4707 = vmatprep.mubr.bf16.mxu1 %v6693_v58  ;;  %v6372_v58 = vld [vmem:[#allocation8 + $0x470] ss:$12 sps:$4 sm:$0xff]   ;;  %v6412_v30 = vld [vmem:[#allocation8 + $0x740] ss:$12 sps:$4 sm:$0xff]  }
 0x235   :  { %5505 = vmatprep.subr.bf16.mxu1 %v6358_v36  ;;  %5491 = vmatprep.subr.bf16.mxu0 %v6359_v38  ;;  %v6413_v36 = vld [vmem:[#allocation8 + $0x680] ss:$12 sps:$4 sm:$0xff]   ;;  %v6414_v38 = vld [vmem:[#allocation8 + $0x548] ss:$12 sps:$4 sm:$0xff]  }
 0x237   :  { %5492 = vmatpush3.bf16.msra.mxu0 %v6361_v41  ;;  %v6417_v41 = vld [vmem:[#allocation8 + $0x668] ss:$12 sps:$4 sm:$0xff]  }
 0x238   :  { %5506 = vmatpush3.bf16.msra.mxu1 %v6360_v39  ;;  %5493 = vmatprep.subr.bf16.mxu0 %v6363_v37  ;;  %v6416_v39 = vld [vmem:[#allocation8 + $0x728] ss:$12 sps:$4 sm:$0xff]   ;;  %v6420_v37 = vld [vmem:[#allocation8 + $0x830] ss:$12 sps:$4 sm:$0xff]  }
 0x239   :  { %5507 = vmatprep.subr.bf16.mxu1 %v6362_v12  ;;  %v6418_v12 = vld [vmem:[#allocation8 + $0x8f0] ss:$12 sps:$4 sm:$0xff]  }
 0x23b   :  { %5494 = vmatpush3.bf16.msra.mxu0 %v6365_v46  ;;  %v6422_v46 = vld [vmem:[#allocation8 + $0x8d8] ss:$12 sps:$4 sm:$0xff]  }
 0x23c   :  { %5508 = vmatpush3.bf16.msra.mxu1 %v6364_v45  ;;  %5495 = vmatprep.subr.bf16.mxu0 %v6367_v48  ;;  %v6421_v45 = vld [vmem:[#allocation8 + $0x650] ss:$12 sps:$4 sm:$0xff]   ;;  %v6424_v48 = vld [vmem:[#allocation8 + $0x818] ss:$12 sps:$4 sm:$0xff]  }
 0x23d   :  { %5509 = vmatprep.subr.bf16.mxu1 %v6366_v47  ;;  %v6423_v47 = vld [vmem:[#allocation8 + $0x6f8] ss:$12 sps:$4 sm:$0xff]  }
 0x23f   :  { %5496 = vmatpush3.bf16.msra.mxu0 %v6369_v50  ;;  %v6426_v50 = vld [vmem:[#allocation8 + $0x8c0] ss:$12 sps:$4 sm:$0xff]  }
 0x240   :  { %5510 = vmatpush3.bf16.msra.mxu1 %v6368_v49  ;;  %5525 = vmatprep.subr.bf16.mxu0 %v6372_v58  ;;  %v6425_v49 = vld [vmem:[#allocation8 + $0x638] ss:$12 sps:$4 sm:$0xff]   ;;  %v6428_v58 = vld [vmem:[#allocation8 + $0x800] ss:$12 sps:$4 sm:$0xff]  }
 0x241   :  { %5511 = vmatprep.subr.bf16.mxu1 %v6370_v51  ;;  %v6427_v51 = vld [vmem:[#allocation8 + $0x6e0] ss:$12 sps:$4 sm:$0xff]  }
 0x242   :  { %4667 = vmatmul.mubr.bf16.vlgmr.msra.gmra.mxu0 %v6669_v0  ;;  %v6383_v0 = vld [vmem:[#allocation8 + $0x188] ss:$12 sps:$4 sm:$0xff]  }
 0x243   :  { %5526 = vmatpush3.bf16.msra.mxu0 %v6373_v56  ;;  %4748 = vmatprep.mubr.bf16.mxu0 %v6719_v40  ;;  %v6387_v40 = vld [vmem:[#allocation8 + $0x410] ss:$12 sps:$4 sm:$0xff]   ;;  %v6430_v56 = vld [vmem:[#allocation8 + $0x8a8] ss:$12 sps:$4 sm:$0xff]  }
 0x244   :  { %5512 = vmatpush3.bf16.msra.mxu1 %v6371_v53  ;;  %5527 = vmatprep.subr.bf16.mxu0 %v6376_v57  ;;  %v6429_v53 = vld [vmem:[#allocation8 + $0x620] ss:$12 sps:$4 sm:$0xff]   ;;  %v6434_v57 = vld [vmem:[#allocation8 + $0x890] ss:$12 sps:$4 sm:$0xff]  }
 0x245   :  { %5513 = vmatprep.subr.bf16.mxu1 %v6374_v43  ;;  %v6431_v43 = vld [vmem:[#allocation8 + $0x6c8] ss:$12 sps:$4 sm:$0xff]  }
 0x247   :  { %5528 = vmatpush3.bf16.msra.mxu0 %v6377_v24  ;;  %v6436_v24 = vld [vmem:[#allocation8 + $0x878] ss:$12 sps:$4 sm:$0xff]  }
 0x248   :  { %5514 = vmatpush3.bf16.msra.mxu1 %v6375_v59  ;;  %5529 = vmatprep.subr.bf16.mxu0 %v6380_v52  ;;  %v6435_v59 = vld [vmem:[#allocation8 + $0x7d0] ss:$12 sps:$4 sm:$0xff]   ;;  %v6438_v52 = vld [vmem:[#allocation8 + $0x860] ss:$12 sps:$4 sm:$0xff]  }
 0x249   :  { %5515 = vmatprep.subr.bf16.mxu1 %v6378_v33  ;;  %v6437_v33 = vld [vmem:[#allocation8 + $0x7b8] ss:$12 sps:$4 sm:$0xff]  }
 0x24b   :  { %5530 = vmatpush3.bf16.msra.mxu0 %v6381_v2  ;;  %v6440_v2 = vld [vmem:[#allocation8 + $0x848] ss:$12 sps:$4 sm:$0xff]  }
 0x24c   :  { %5516 = vmatpush3.bf16.msra.mxu1 %v6379_v61  ;;  %5531 = vmatprep.subr.bf16.mxu0 %v6384_v44  ;;  %v6439_v61 = vld [vmem:[#allocation8 + $0x7a0] ss:$12 sps:$4 sm:$0xff]  }
 0x24d   :  { %5517 = vmatprep.subr.bf16.mxu1 %v6382_v7  ;;  %v6441_v7 = vld [vmem:[#allocation8 + $0x788] ss:$12 sps:$4 sm:$0xff]  }
 0x24f   :  { %5532 = vmatpush3.bf16.msra.mxu0 %v6385_v3 }
 0x250   :  { %5518 = vmatpush3.bf16.msra.mxu1 %v6383_v0  ;;  %5533 = vmatprep.subr.bf16.mxu0 %v6387_v40 }
 0x251   :  { %5547 = vmatprep.subr.bf16.mxu1 %v6386_v4 }
 0x253   :  { %4708 = vmatmul.mubr.bf16.vlgmr.msra.gmra.mxu1 %v6708_v34  ;;  %5534 = vmatpush3.bf16.msra.mxu0 %v6389_v5  ;;  %v6400_v34 = vld [vmem:[#allocation8 + $0x4e8] ss:$12 sps:$4 sm:$0xff]   ;;  %v6782_v5 = vld [vmem:[#allocation10] sm:$0x7] }
 0x254   :  { %5548 = vmatpush3.bf16.msra.mxu1 %v6388_v13  ;;  %4789 = vmatprep.mubr.bf16.mxu1 %v6729_v42  ;;  %v6401_v42 = vld [vmem:[#allocation8 + $0x308] ss:$12 sps:$4 sm:$0xff]  }
 0x255   :  { %5549 = vmatprep.subr.bf16.mxu1 %v6390_v20  ;;  %5535 = vmatprep.subr.bf16.mxu0 %v6391_v6 }
 0x257   :  { %5536 = vmatpush3.bf16.msra.mxu0 %v6393_v8 }
 0x258   :  { %5550 = vmatpush3.bf16.msra.mxu1 %v6392_v23  ;;  %5537 = vmatprep.subr.bf16.mxu0 %v6395_v55  ;;  %v2828_v23 = vrot.slane %v6782_v5, %v6663_v25  ;;  %v2832_v55 = vrot.slane %v6782_v5, %v6672_v63 }
 0x259   :  { %5551 = vmatprep.subr.bf16.mxu1 %v6394_v62 }
 0x25b   :  { %5538 = vmatpush3.bf16.msra.mxu0 %v6397_v10 }
 0x25c   :  { %5552 = vmatpush3.bf16.msra.mxu1 %v6396_v1  ;;  %5539 = vmatprep.subr.bf16.mxu0 %v6399_v14 }
 0x25d   :  { %5553 = vmatprep.subr.bf16.mxu1 %v6398_v11 }
 0x25f   :  { %5540 = vmatpush3.bf16.msra.mxu0 %v6401_v42 }
 0x260   :  { %5554 = vmatpush3.bf16.msra.mxu1 %v6400_v34  ;;  %5569 = vmatprep.subr.bf16.mxu0 %v6404_v29 }
 0x261   :  { %5555 = vmatprep.subr.bf16.mxu1 %v6402_v15 }
 0x262   :  { %4749 = vmatmul.mubr.bf16.vlgmr.msra.gmra.mxu0 %v6738_v54  ;;  %v6415_v54 = vld [vmem:[#allocation8 + $0x488] ss:$12 sps:$4 sm:$0xff]   ;;  %v4410_v44 = vpop.f32.mrf.mxu0 }
 0x263   :  { %5570 = vmatpush3.bf16.msra.mxu0 %v6405_v17  ;;  %4830 = vmatprep.mubr.bf16.mxu0 %v6750_v26  ;;  %v6419_v26 = vld [vmem:[#allocation8 + $0x710] ss:$12 sps:$4 sm:$0xff]   ;;  %v4453_v4 = vpop.f32.mrf.mxu1  ;;  %v4411_v1 = vadd.f32 %v4410_v44, %v2828_v23 }
 0x264   :  { %5556 = vmatpush3.bf16.msra.mxu1 %v6403_v16  ;;  %5571 = vmatprep.subr.bf16.mxu0 %v6408_v19  ;;  %v4412_v0 = vpop.f32.mrf.mxu0 }
 0x265   :  { %5557 = vmatprep.subr.bf16.mxu1 %v6406_v18  ;;  %v4413_v11 = vadd.f32 %v4412_v0, %v2832_v55  ;;  %v4454_v42 = vadd.f32 %v4453_v4, %v4411_v1  ;;  %v2836_v4 = vrot.slane %v6782_v5, %v6697_v35 }
 0x266   :  { %v4414_v3 = vpop.f32.mrf.mxu0 }
 0x267   :  { %5572 = vmatpush3.bf16.msra.mxu0 %v6409_v22  ;;  %v4415_v15 = vadd.f32 %v4414_v3, %v2828_v23 }
 0x268   :  { %5558 = vmatpush3.bf16.msra.mxu1 %v6407_v21  ;;  %5573 = vmatprep.subr.bf16.mxu0 %v6412_v30  ;;  %v4416_v40 = vpop.f32.mrf.mxu0 }
 0x269   :  { %5559 = vmatprep.subr.bf16.mxu1 %v6410_v27  ;;  %v4417_v16 = vadd.f32 %v4416_v40, %v2832_v55 }
 0x26b   :  { %5574 = vmatpush3.bf16.msra.mxu0 %v6413_v36 }
 0x26c   :  { %5560 = vmatpush3.bf16.msra.mxu1 %v6411_v31  ;;  %5575 = vmatprep.subr.bf16.mxu0 %v6416_v39 }
 0x26d   :  { %5561 = vmatprep.subr.bf16.mxu1 %v6414_v38 }
 0x26f   :  { %5576 = vmatpush3.bf16.msra.mxu0 %v6417_v41 }
 0x270   :  { %5562 = vmatpush3.bf16.msra.mxu1 %v6415_v54  ;;  %5577 = vmatprep.subr.bf16.mxu0 %v6419_v26 }
 0x271   :  { %5591 = vmatprep.subr.bf16.mxu1 %v6418_v12 }
 0x273   :  { %4790 = vmatmul.mubr.bf16.vlgmr.msra.gmra.mxu1 %v6740_v9  ;;  %5578 = vmatpush3.bf16.msra.mxu0 %v6421_v45  ;;  %v6432_v9 = vld [vmem:[#allocation8 + $0x7e8] ss:$12 sps:$4 sm:$0xff]  }
 0x274   :  { %5592 = vmatpush3.bf16.msra.mxu1 %v6420_v37  ;;  %4871 = vmatprep.mubr.bf16.mxu1 %v6765_v28  ;;  %v6433_v28 = vld [vmem:[#allocation8 + $0x608] ss:$12 sps:$4 sm:$0xff]  }
 0x275   :  { %5593 = vmatprep.subr.bf16.mxu1 %v6422_v46  ;;  %5579 = vmatprep.subr.bf16.mxu0 %v6423_v47 }
 0x277   :  { %5580 = vmatpush3.bf16.msra.mxu0 %v6425_v49 }
 0x278   :  { %5594 = vmatpush3.bf16.msra.mxu1 %v6424_v48  ;;  %5581 = vmatprep.subr.bf16.mxu0 %v6427_v51 }
 0x279   :  { %5595 = vmatprep.subr.bf16.mxu1 %v6426_v50 }
 0x27b   :  { %5582 = vmatpush3.bf16.msra.mxu0 %v6429_v53 }
 0x27c   :  { %5596 = vmatpush3.bf16.msra.mxu1 %v6428_v58  ;;  %5583 = vmatprep.subr.bf16.mxu0 %v6431_v43 }
 0x27d   :  { %5597 = vmatprep.subr.bf16.mxu1 %v6430_v56 }
 0x27f   :  { %5584 = vmatpush3.bf16.msra.mxu0 %v6433_v28 }
 0x280   :  { %5598 = vmatpush3.bf16.msra.mxu1 %v6432_v9 }
 0x281   :  { %5599 = vmatprep.subr.bf16.mxu1 %v6434_v57 }
 0x282   :  { %4831 = vmatmul.mubr.bf16.vlgmr.msra.gmra.mxu0 %v6756_v60  ;;  %v4455_v60 = vpop.f32.mrf.mxu1 }
 0x283   :  { %v4456_v29 = vadd.f32 %v4455_v60, %v4413_v11 }
 0x284   :  { %5600 = vmatpush3.bf16.msra.mxu1 %v6435_v59  ;;  %v4457_v20 = vpop.f32.mrf.mxu1 }
 0x285   :  { %5601 = vmatprep.subr.bf16.mxu1 %v6436_v24  ;;  %v4458_v21 = vadd.f32 %v4457_v20, %v4415_v15 }
 0x286   :  { %v4459_v8 = vpop.f32.mrf.mxu1 }
 0x287   :  { %v4460_v22 = vadd.f32 %v4459_v8, %v4417_v16 }
 0x288   :  { %5602 = vmatpush3.bf16.msra.mxu1 %v6437_v33 }
 0x289   :  { %5603 = vmatprep.subr.bf16.mxu1 %v6438_v52 }
 0x28c   :  { %5604 = vmatpush3.bf16.msra.mxu1 %v6439_v61 }
 0x28d   :  { %5605 = vmatprep.subr.bf16.mxu1 %v6440_v2 }
 0x290   :  { %5606 = vmatpush3.bf16.msra.mxu1 %v6441_v7 }
 0x293   :  { %4872 = vmatmul.mubr.bf16.vlgmr.msra.gmra.mxu1 %v6767_v32 }
 0x2a2   :  { %v4496_v13 = vpop.f32.mrf.mxu0 }
 0x2a3   :  { %v4539_v32 = vpop.f32.mrf.mxu1  ;;  %v4497_v17 = vadd.f32 %v4496_v13, %v4454_v42 }
 0x2a4   :  { %v4498_v6 = vpop.f32.mrf.mxu0 }
 0x2a5   :  { %v4541_v14 = vpop.f32.mrf.mxu1  ;;  %v4499_v25 = vadd.f32 %v4498_v6, %v4456_v29  ;;  %v4540_v27 = vadd.f32 %v4539_v32, %v4497_v17 }
 0x2a6   :  { %v4500_v62 = vpop.f32.mrf.mxu0 }
 0x2a7   :  { %v4543_v18 = vpop.f32.mrf.mxu1  ;;  %v4501_v30 = vadd.f32 %v4500_v62, %v4458_v21  ;;  %v4542_v36 = vadd.f32 %v4541_v14, %v4499_v25 }
 0x2a8   :  { %v4502_v10 = vpop.f32.mrf.mxu0 }
 0x2a9   :  { %v4545_v31 = vpop.f32.mrf.mxu1  ;;  %v4503_v38 = vadd.f32 %v4502_v10, %v4460_v22  ;;  %v4544_v41 = vadd.f32 %v4543_v18, %v4501_v30 }
 0x2ab   :  { %v4546_v46 = vadd.f32 %v4545_v31, %v4503_v38 }
 0x2e2   :  { %v4582_v34 = vpop.f32.mrf.mxu0 }
 0x2e3   :  { %v4583_v39 = vadd.f32 %v4582_v34, %v4540_v27 }
 0x2e4   :  { %v4584_v19 = vpop.f32.mrf.mxu0 }
 0x2e5   :  { %v4585_v12 = vadd.f32 %v4584_v19, %v4542_v36 }
 0x2e6   :  { %v4586_v63 = vpop.f32.mrf.mxu0 }
 0x2e7   :  { %v4587_v47 = vadd.f32 %v4586_v63, %v4544_v41 }
 0x2e8   :  { %v4588_v37 = vpop.f32.mrf.mxu0 }
 0x2e9   :  { %v4589_v50 = vadd.f32 %v4588_v37, %v4546_v46 }
 0x2f3   :  { %v4625_v54 = vpop.f32.mrf.mxu1 }
 0x2f4   :  { %v4626_v26 = vadd.f32 %v4625_v54, %v4583_v39 }
 0x2f5   :  { %v4627_v45 = vpop.f32.mrf.mxu1 }
 0x2f6   :  { %4880 = vst [vmem:[#allocation11] sm:$0xff] %v4626_v26  ;;  %v4628_v48 = vadd.f32 %v4627_v45, %v4585_v12 }
 0x2f7   :  { %v4629_v49 = vpop.f32.mrf.mxu1 }
 0x2f8   :  { %4881 = vst [vmem:[#allocation11 + $0x8] sm:$0xff] %v4628_v48  ;;  %v4630_v51 = vadd.f32 %v4629_v49, %v4587_v47 }
 0x2f9   :  { %v4631_v58 = vpop.f32.mrf.mxu1 }
 0x2fa   :  { %4883 = vst [vmem:[#allocation11 + $0x18] sm:$0xff] %v4630_v51  ;;  %v4632_v53 = vadd.f32 %v4631_v58, %v4589_v50 }
 0x2fc   :  { %4884 = vst [vmem:[#allocation11 + $0x20] sm:$0xff] %v4632_v53 }
 0x302   :  { %v5497_v56 = vpop.f32.mrf.mxu0 }
 0x304   :  { %v5498_v43 = vpop.f32.mrf.mxu0 }
 0x305   :  { %v5499_v40 = vadd.f32 %v5498_v43, %v5497_v56 }
 0x306   :  { %v5500_v9 = vpop.f32.mrf.mxu0 }
 0x307   :  { %v4669_v6 = vadd.f32 %v5499_v40, %v2836_v4 }
 0x308   :  { %v5501_v28 = vpop.f32.mrf.mxu0 }
 0x309   :  { %v5502_v23 = vadd.f32 %v5501_v28, %v5500_v9 }
 0x30b   :  { %v4672_v11 = vadd.f32 %v5502_v23, %v2836_v4 }
 0x313   :  { %v5519_v57 = vpop.f32.mrf.mxu1 }
 0x315   :  { %v5520_v24 = vpop.f32.mrf.mxu1 }
 0x316   :  { %v5521_v13 = vadd.f32 %v5520_v24, %v5519_v57 }
 0x317   :  { %v5522_v52 = vpop.f32.mrf.mxu1 }
 0x318   :  { %v4710_v55 = vadd.f32 %v5521_v13, %v4669_v6 }
 0x319   :  { %v5523_v2 = vpop.f32.mrf.mxu1 }
 0x31a   :  { %v5524_v32 = vadd.f32 %v5523_v2, %v5522_v52 }
 0x31c   :  { %v4713_v16 = vadd.f32 %v5524_v32, %v4672_v11 }
 0x322   :  { %v5541_v59 = vpop.f32.mrf.mxu0 }
 0x324   :  { %v5542_v33 = vpop.f32.mrf.mxu0 }
 0x325   :  { %v5543_v8 = vadd.f32 %v5542_v33, %v5541_v59 }
 0x326   :  { %v5544_v61 = vpop.f32.mrf.mxu0 }
 0x327   :  { %v4751_v14 = vadd.f32 %v5543_v8, %v4710_v55 }
 0x328   :  { %v5545_v7 = vpop.f32.mrf.mxu0 }
 0x329   :  { %v5546_v34 = vadd.f32 %v5545_v7, %v5544_v61 }
 0x32b   :  { %v4754_v18 = vadd.f32 %v5546_v34, %v4713_v16 }
 0x333   :  { %v5563_v44 = vpop.f32.mrf.mxu1 }
 0x335   :  { %v5564_v3 = vpop.f32.mrf.mxu1 }
 0x336   :  { %v5565_v1 = vadd.f32 %v5564_v3, %v5563_v44 }
 0x337   :  { %v5566_v20 = vpop.f32.mrf.mxu1 }
 0x338   :  { %v4792_v35 = vadd.f32 %v5565_v1, %v4751_v14 }
 0x339   :  { %v5567_v10 = vpop.f32.mrf.mxu1 }
 0x33a   :  { %v5568_v5 = vadd.f32 %v5567_v10, %v5566_v20 }
 0x33c   :  { %v4795_v27 = vadd.f32 %v5568_v5, %v4754_v18 }
 0x342   :  { %v5585_v0 = vpop.f32.mrf.mxu0 }
 0x344   :  { %v5586_v60 = vpop.f32.mrf.mxu0 }
 0x345   :  { %v5587_v42 = vadd.f32 %v5586_v60, %v5585_v0 }
 0x346   :  { %v5588_v62 = vpop.f32.mrf.mxu0 }
 0x347   :  { %v4833_v19 = vadd.f32 %v5587_v42, %v4792_v35 }
 0x348   :  { %v5589_v15 = vpop.f32.mrf.mxu0 }
 0x349   :  { %v5590_v21 = vadd.f32 %v5589_v15, %v5588_v62 }
 0x34b   :  { %v4836_v63 = vadd.f32 %v5590_v21, %v4795_v27 }
 0x353   :  { %v5607_v29 = vpop.f32.mrf.mxu1 }
 0x355   :  { %v5608_v17 = vpop.f32.mrf.mxu1 }
 0x356   :  { %v5609_v25 = vadd.f32 %v5608_v17, %v5607_v29 }
 0x357   :  { %v5610_v22 = vpop.f32.mrf.mxu1 }
 0x358   :  { %v4874_v30 = vadd.f32 %v5609_v25, %v4833_v19 }
 0x359   :  { %v5611_v31 = vpop.f32.mrf.mxu1 }
 0x35a   :  { %4882 = vst [vmem:[#allocation11 + $0x10] sm:$0xff] %v4874_v30  ;;  %v5612_v36 = vadd.f32 %v5611_v31, %v5610_v22 }
 0x35c   :  { %v4877_v38 = vadd.f32 %v5612_v36, %v4836_v63 }
 0x35e   :  { %4885 = vst [vmem:[#allocation11 + $0x28] sm:$0xff] %v4877_v38 }
 0x35f   :  { %6554 = shalt.err (!%p6551_p1)
}
 0x360   :  { %4897 = dma.vmem_to_hbm [thread:$0]  %s4892_s4, 768, %s6801_s5, [#allocation4], %s6578_s9, %s6578_s9, %s6579_s10  }
 0x361   :  { %6569 = dma.done.wait [#allocation4], 768  }
 0x362   :  { %6570 = vsyncadd [#allocation4], 4294966528 }
 0x363   :  { %4901 = vsyncpa [#allocation3], 1 }
 0x364   :  { %4902 = vsyncpa [#allocation6], 1 }
 0x365   :  { %4903 = vsyncpa [#allocation9], 1 }
 0x366   :  { %4904 = vsyncpa [#allocation4], 1 }

</bundles_post_ra>
